<compile_context>
chip_gen: v5e
topology: v5e:2x2
jax: 0.10.0
libtpu: 0.0.40
codegen_flags: <defaults>
</compile_context>

<pallas_src>
import functools

import jax
import jax.numpy as jnp
from jax.experimental import pallas as pl
from jax.experimental.pallas import tpu as pltpu


def _round_up(n, m):
    return ((n + m - 1) // m) * m


def _gelu_exact(x):
    # PyTorch F.gelu default (approximate='none'): 0.5 * x * (1 + erf(x / sqrt(2)))
    return 0.5 * x * (1.0 + jax.lax.erf(x * 0.7071067811865475))


def _layer(x, w1, w2, wg_b, wg_r, cdt):
    """One gated-residual layer on an f32 (tm, dim) tile."""
    res = x
    hidden = _gelu_exact(jnp.dot(x.astype(cdt), w1, preferred_element_type=jnp.float32))
    branch = jnp.dot(hidden.astype(cdt), w2, preferred_element_type=jnp.float32)
    # Two K=dim gate matmuls: same MXU cycles as one K=2*dim push, but no (tm, 2*dim)
    # concat copy; on v7x the add folds into the MXU result-buffer accumulate.
    gates = (jnp.dot(branch.astype(cdt), wg_b, preferred_element_type=jnp.float32)
             + jnp.dot(res.astype(cdt), wg_r, preferred_element_type=jnp.float32))
    g = jax.nn.sigmoid(gates)            # EUP transcendental; kept exact for PyTorch parity
    return res + g * (branch - res)      # == res.lerp(branch, g)


def _resident_kernel(x_ref, w1_ref, w2_ref, wgb_ref, wgr_ref, wf_ref, o_ref, *, depth):
    """All layer weights whole-resident in VMEM; grid = (row tiles,)."""
    cdt = w1_ref.dtype                   # MXU operand dtype (bf16 weights -> bf16 matmuls)
    x = x_ref[...].astype(jnp.float32)
    if depth <= 8:
        # Static layer indices: matmuls stream weights straight from their VMEM location.
        for l in range(depth):
            x = _layer(x, w1_ref[l], w2_ref[l], wgb_ref[l], wgr_ref[l], cdt)
    else:
        def body(l, x):
            return _layer(x, w1_ref[l], w2_ref[l], wgb_ref[l], wgr_ref[l], cdt)
        # TODO(synk): verify in the bundle dump that dynamic-index weight reads under
        # fori_loop do not materialize a per-iteration VMEM->VMEM copy of the layer slab.
        x = jax.lax.fori_loop(0, depth, body, x)
    o_ref[...] = jnp.dot(x.astype(cdt), wf_ref[...],
                         preferred_element_type=jnp.float32).astype(o_ref.dtype)


def _streaming_kernel(x_ref, w1_ref, w2_ref, wgb_ref, wgr_ref, wf_ref, o_ref, x_state):
    """Weights streamed per layer; grid = (row tiles, depth), depth innermost ('arbitrary')."""
    l = pl.program_id(1)
    cdt = w1_ref.dtype

    @pl.when(l == 0)
    def _():
        x_state[...] = x_ref[...].astype(jnp.float32)

    x = _layer(x_state[...], w1_ref[0], w2_ref[0], wgb_ref[0], wgr_ref[0], cdt)
    x_state[...] = x

    @pl.when(l == pl.num_programs(1) - 1)
    def _():
        o_ref[...] = jnp.dot(x.astype(cdt), wf_ref[...],
                             preferred_element_type=jnp.float32).astype(o_ref.dtype)


def _vmem_capacity_bytes():
    # Host-side probe at trace time only (never a runtime fallback).
    try:
        return int(getattr(pltpu.get_tpu_info(), "vmem_capacity_bytes"))
    except Exception:
        return 64 * 1024 * 1024          # conservative floor: v7x per-TensorCore VMEM


def gated_residual_memory_mlp(x, w1, w2, wg, w_final, *,
                              mxu_dtype=None, force_streaming=False):
    """x: (N, dim); w1: (depth, dim, dh); w2: (depth, dh, dim);
    wg: (depth, 2*dim, dim); w_final: (dim, dim).  Any N (rows are padded).

    mxu_dtype: optionally cast matmul operands (e.g. jnp.bfloat16) while keeping all
    element-wise math and accumulation in f32.  Default: use the weights' dtype.
    """
    N, dim = x.shape
    depth, _, dim_hidden = w1.shape
    assert w2.shape == (depth, dim_hidden, dim)
    assert wg.shape == (depth, 2 * dim, dim)
    assert w_final.shape == (dim, dim)

    # ---- lane-dense padding of feature dims (mathematically inert, sliced off). ----
    dim_p = _round_up(dim, 128)
    dh_p = _round_up(dim_hidden, 128)
    wdt = jnp.dtype(mxu_dtype) if mxu_dtype is not None else jnp.dtype(w1.dtype)

    def pad_w(w, rows, cols):
        pads = ((0, 0),) * (w.ndim - 2) + ((0, rows - w.shape[-2]), (0, cols - w.shape[-1]))
        return jnp.pad(w, pads).astype(wdt)

    w1_p = pad_w(w1, dim_p, dh_p)
    w2_p = pad_w(w2, dh_p, dim_p)
    wg_b = pad_w(wg[:, :dim, :], dim_p, dim_p)   # gate weights applied to branch_out
    wg_r = pad_w(wg[:, dim:, :], dim_p, dim_p)   # gate weights applied to the residual
    wf_p = pad_w(w_final, dim_p, dim_p)

    # ---- static path / tile selection (trace time; no runtime fallback). ----
    vmem_cap = _vmem_capacity_bytes()
    big_vmem = vmem_cap >= (96 << 20)            # 128 MiB (v5e/v6e) vs 64 MiB (v7x)
    tm_max = 512 if big_vmem else 256
    if N <= 2 * tm_max:
        # Keep >= 2 row tiles when possible so the "parallel" row axis can shard across
        # both v7x TensorCores (harmless elsewhere: one extra ~0.35us grid step).
        tm = min(tm_max, _round_up(max(pl.cdiv(N, 2), 8), 32))
    else:
        tm = tm_max

    x_items = jnp.dtype(x.dtype).itemsize
    w_items = wdt.itemsize
    layer_w_elems = dim_p * dh_p + dh_p * dim_p + 2 * dim_p * dim_p
    weight_bytes = (depth * layer_w_elems + dim_p * dim_p) * w_items
    margin = 4 << 20
    reserve = 4 << 20

    def resident_need(tm_):
        io = 2 * 2 * tm_ * dim_p * x_items                 # double-buffered x/out tiles
        interm = 6 * tm_ * max(dh_p, dim_p) * 4            # f32 temps (hidden/branch/gates/..)
        return weight_bytes + io + interm + margin         # weights single-buffered

    def streaming_need(tm_):
        w_res = (2 * layer_w_elems + dim_p * dim_p) * w_items   # 2 layers in flight + final
        io = 2 * 2 * tm_ * dim_p * x_items
        interm = 6 * tm_ * max(dh_p, dim_p) * 4 + tm_ * dim_p * 4   # temps + x_state scratch
        return w_res + io + interm + margin

    use_streaming = force_streaming or (resident_need(tm) > vmem_cap - reserve)
    if use_streaming:
        while streaming_need(tm) > vmem_cap - reserve and tm > 64:
            tm = max(64, tm // 2)
        need = streaming_need(tm)
        if need > vmem_cap - reserve:
            raise ValueError(
                f"GatedResidualMemoryMLP: per-layer weights need ~{need / 2**20:.1f} MiB of "
                f"VMEM but only {vmem_cap / 2**20:.0f} MiB is available; dim/dim_hidden too "
                f"large for this kernel.")
    else:
        need = resident_need(tm)
    vmem_limit = int(need + need // 4)               # 25% headroom for compiler temporaries
    vmem_limit = max(16 << 20, min(vmem_limit, vmem_cap - (2 << 20)))

    n_pad = _round_up(N, tm)
    x_p = jnp.pad(x, ((0, n_pad - N), (0, dim_p - dim)))

    flops = 2 * n_pad * (depth * layer_w_elems + dim_p * dim_p)
    cost = pl.CostEstimate(
        flops=int(flops),
        transcendentals=int(2 * n_pad * depth * (dh_p + dim_p)),   # erf + sigmoid (exp-based)
        bytes_accessed=int(2 * n_pad * dim_p * x_items + weight_bytes))

    out_shape = jax.ShapeDtypeStruct((n_pad, dim_p), x.dtype)

    if use_streaming:
        grid = (n_pad // tm, depth)
        in_specs = [
            pl.BlockSpec((tm, dim_p), lambda i, l: (i, 0)),
            pl.BlockSpec((1, dim_p, dh_p), lambda i, l: (l, 0, 0)),
            pl.BlockSpec((1, dh_p, dim_p), lambda i, l: (l, 0, 0)),
            pl.BlockSpec((1, dim_p, dim_p), lambda i, l: (l, 0, 0)),
            pl.BlockSpec((1, dim_p, dim_p), lambda i, l: (l, 0, 0)),
            pl.BlockSpec((dim_p, dim_p), lambda i, l: (0, 0)),
        ]
        out_specs = pl.BlockSpec((tm, dim_p), lambda i, l: (i, 0))
        call = pl.pallas_call(
            _streaming_kernel,
            out_shape=out_shape,
            grid_spec=pltpu.PrefetchScalarGridSpec(
                num_scalar_prefetch=0, grid=grid,
                in_specs=in_specs, out_specs=out_specs,
                scratch_shapes=[pltpu.VMEM((tm, dim_p), jnp.float32)]),
            compiler_params=pltpu.CompilerParams(
                dimension_semantics=("parallel", "arbitrary"),
                vmem_limit_bytes=vmem_limit),
            cost_estimate=cost)
    else:
        grid = (n_pad // tm,)
        # Whole weight stacks resident in VMEM, single-buffered (not pipelined).
        resident = pl.BlockSpec(memory_space=pltpu.MemorySpace.VMEM)
        in_specs = [pl.BlockSpec((tm, dim_p), lambda i: (i, 0))] + [resident] * 5
        out_specs = pl.BlockSpec((tm, dim_p), lambda i: (i, 0))
        call = pl.pallas_call(
            functools.partial(_resident_kernel, depth=depth),
            out_shape=out_shape,
            grid_spec=pltpu.PrefetchScalarGridSpec(
                num_scalar_prefetch=0, grid=grid,
                in_specs=in_specs, out_specs=out_specs),
            compiler_params=pltpu.CompilerParams(
                dimension_semantics=("parallel",),
                vmem_limit_bytes=vmem_limit),
            cost_estimate=cost)

    out = call(x_p, w1_p, w2_p, wg_b, wg_r, wf_p)
    return out[:N, :dim]


# ----------------------------- test harness -----------------------------

def _xavier_uniform(key, shape, dtype=jnp.float32):
    fan_in, fan_out = shape[-2], shape[-1]
    bound = (6.0 / (fan_in + fan_out)) ** 0.5
    return jax.random.uniform(key, shape, dtype, minval=-bound, maxval=bound)


def _reference(x, w1, w2, wg, w_final):
    prec = jax.lax.Precision.HIGHEST
    for l in range(w1.shape[0]):
        res = x
        hidden = _gelu_exact(jnp.dot(x, w1[l], precision=prec))
        branch = jnp.dot(hidden, w2[l], precision=prec)
        gates = jnp.dot(jnp.concatenate([branch, res], axis=-1), wg[l], precision=prec)
        x = res + jax.nn.sigmoid(gates) * (branch - res)
    return jnp.dot(x, w_final, precision=prec)


if __name__ == "__main__":
    # GatedResidualMemoryMLP(dim=32, depth=2, expansion_factor=4.0) on x: (batch=2, seq=8, 32)
    batch, seq, dim, depth = 2, 8, 32, 2
    dim_hidden = int(dim * 4.0)

    key = jax.random.PRNGKey(0)
    kx, k1, k2, kg, kf = jax.random.split(key, 5)
    x = jax.random.normal(kx, (batch, seq, dim), jnp.float32)
    w1 = jnp.stack([_xavier_uniform(k, (dim, dim_hidden)) for k in jax.random.split(k1, depth)])
    w2 = jnp.stack([_xavier_uniform(k, (dim_hidden, dim)) for k in jax.random.split(k2, depth)])
    wg = jnp.stack([_xavier_uniform(k, (2 * dim, dim)) for k in jax.random.split(kg, depth)])
    w_final = _xavier_uniform(kf, (dim, dim))

    x2d = x.reshape(batch * seq, dim)
    ref = _reference(x2d, w1, w2, wg, w_final)

    # Resident-weights path (f32 end to end).
    out = jax.block_until_ready(gated_residual_memory_mlp(x2d, w1, w2, wg, w_final))
    err = float(jnp.max(jnp.abs(out - ref)))
    assert jnp.allclose(out, ref, atol=2e-4, rtol=2e-4), f"resident path max abs err {err}"

    # Depth-streaming path (same math; per-layer weight blocks over an 'arbitrary' axis).
    out_s = jax.block_until_ready(
        gated_residual_memory_mlp(x2d, w1, w2, wg, w_final, force_streaming=True))
    err_s = float(jnp.max(jnp.abs(out_s - ref)))
    assert jnp.allclose(out_s, ref, atol=2e-4, rtol=2e-4), f"streaming path max abs err {err_s}"

    # bf16 MXU operands with f32 accumulation (loose-tolerance sanity check).
    out_bf = jax.block_until_ready(
        gated_residual_memory_mlp(x2d, w1, w2, wg, w_final, mxu_dtype=jnp.bfloat16))
    err_bf = float(jnp.max(jnp.abs(out_bf.astype(jnp.float32) - ref)))
    assert jnp.allclose(out_bf.astype(jnp.float32), ref, atol=1e-1, rtol=1e-1), \
        f"bf16 path max abs err {err_bf}"

    print("KERNEL_OK")
</pallas_src>

<mosaic_0001>
module attributes {stable_mosaic.version = 11 : i64} {
  func.func @_resident_kernel(%arg0: i32, %arg1: memref<32x128xf32, #tpu.memory_space<vmem>>, %arg2: memref<2x128x128xf32, #tpu.memory_space<vmem>>, %arg3: memref<2x128x128xf32, #tpu.memory_space<vmem>>, %arg4: memref<2x128x128xf32, #tpu.memory_space<vmem>>, %arg5: memref<2x128x128xf32, #tpu.memory_space<vmem>>, %arg6: memref<128x128xf32, #tpu.memory_space<vmem>>, %arg7: memref<32x128xf32, #tpu.memory_space<vmem>>) attributes {dimension_semantics = [#tpu.dimension_semantics<parallel>], iteration_bounds = array<i64: 1>, scalar_prefetch = 0 : i64, scratch_operands = 0 : i64, tpu.core_type = #tpu.core_type<tc>, window_params = [{transform_indices = @transform_0, window_bounds = array<i64: 32, 128>}, {pipeline_mode = #tpu.pipeline_mode<synchronous>, transform_indices = @transform_1, window_bounds = array<i64: 2, 128, 128>}, {pipeline_mode = #tpu.pipeline_mode<synchronous>, transform_indices = @transform_2, window_bounds = array<i64: 2, 128, 128>}, {pipeline_mode = #tpu.pipeline_mode<synchronous>, transform_indices = @transform_3, window_bounds = array<i64: 2, 128, 128>}, {pipeline_mode = #tpu.pipeline_mode<synchronous>, transform_indices = @transform_4, window_bounds = array<i64: 2, 128, 128>}, {pipeline_mode = #tpu.pipeline_mode<synchronous>, transform_indices = @transform_5, window_bounds = array<i64: 128, 128>}, {transform_indices = @transform_6, window_bounds = array<i64: 32, 128>}]} {
    %c0 = arith.constant 0 : index
    %c0_0 = arith.constant 0 : index
    %0 = vector.load %arg1[%c0, %c0_0] : memref<32x128xf32, #tpu.memory_space<vmem>>, vector<32x128xf32>
    %c0_1 = arith.constant 0 : index
    %c0_2 = arith.constant 0 : index
    %c0_3 = arith.constant 0 : index
    %1 = vector.load %arg2[%c0_1, %c0_2, %c0_3] : memref<2x128x128xf32, #tpu.memory_space<vmem>>, vector<1x128x128xf32>
    %2 = vector.shape_cast %1 : vector<1x128x128xf32> to vector<128x128xf32>
    %c0_4 = arith.constant 0 : index
    %c0_5 = arith.constant 0 : index
    %c0_6 = arith.constant 0 : index
    %3 = vector.load %arg3[%c0_4, %c0_5, %c0_6] : memref<2x128x128xf32, #tpu.memory_space<vmem>>, vector<1x128x128xf32>
    %4 = vector.shape_cast %3 : vector<1x128x128xf32> to vector<128x128xf32>
    %c0_7 = arith.constant 0 : index
    %c0_8 = arith.constant 0 : index
    %c0_9 = arith.constant 0 : index
    %5 = vector.load %arg4[%c0_7, %c0_8, %c0_9] : memref<2x128x128xf32, #tpu.memory_space<vmem>>, vector<1x128x128xf32>
    %6 = vector.shape_cast %5 : vector<1x128x128xf32> to vector<128x128xf32>
    %c0_10 = arith.constant 0 : index
    %c0_11 = arith.constant 0 : index
    %c0_12 = arith.constant 0 : index
    %7 = vector.load %arg5[%c0_10, %c0_11, %c0_12] : memref<2x128x128xf32, #tpu.memory_space<vmem>>, vector<1x128x128xf32>
    %8 = vector.shape_cast %7 : vector<1x128x128xf32> to vector<128x128xf32>
    %cst = arith.constant dense<0.000000e+00> : vector<32x128xf32>
    %9 = tpu.matmul %0, %2, %cst {dimension_numbers = #tpu.dot_dimension_numbers<[1], [0], [0], [1], [0, 0, 1, 1], [], []>} : vector<32x128xf32>, vector<128x128xf32>, vector<32x128xf32> -> vector<32x128xf32>
    %cst_13 = arith.constant 5.000000e-01 : f32
    %10 = vector.broadcast %cst_13 : f32 to vector<32x128xf32>
    %11 = arith.mulf %10, %9 : vector<32x128xf32>
    %cst_14 = arith.constant 0.707106769 : f32
    %12 = vector.broadcast %cst_14 : f32 to vector<32x128xf32>
    %13 = arith.mulf %9, %12 : vector<32x128xf32>
    %14 = math.erf %13 : vector<32x128xf32>
    %cst_15 = arith.constant 1.000000e+00 : f32
    %15 = vector.broadcast %cst_15 : f32 to vector<32x128xf32>
    %16 = arith.addf %15, %14 : vector<32x128xf32>
    %17 = arith.mulf %11, %16 : vector<32x128xf32>
    %cst_16 = arith.constant dense<0.000000e+00> : vector<32x128xf32>
    %18 = tpu.matmul %17, %4, %cst_16 {dimension_numbers = #tpu.dot_dimension_numbers<[1], [0], [0], [1], [0, 0, 1, 1], [], []>} : vector<32x128xf32>, vector<128x128xf32>, vector<32x128xf32> -> vector<32x128xf32>
    %cst_17 = arith.constant dense<0.000000e+00> : vector<32x128xf32>
    %19 = tpu.matmul %18, %6, %cst_17 {dimension_numbers = #tpu.dot_dimension_numbers<[1], [0], [0], [1], [0, 0, 1, 1], [], []>} : vector<32x128xf32>, vector<128x128xf32>, vector<32x128xf32> -> vector<32x128xf32>
    %cst_18 = arith.constant dense<0.000000e+00> : vector<32x128xf32>
    %20 = tpu.matmul %0, %8, %cst_18 {dimension_numbers = #tpu.dot_dimension_numbers<[1], [0], [0], [1], [0, 0, 1, 1], [], []>} : vector<32x128xf32>, vector<128x128xf32>, vector<32x128xf32> -> vector<32x128xf32>
    %21 = arith.addf %19, %20 : vector<32x128xf32>
    %22 = arith.negf %21 : vector<32x128xf32>
    %23 = math.exp %22 : vector<32x128xf32>
    %cst_19 = arith.constant 1.000000e+00 : f32
    %24 = vector.broadcast %cst_19 : f32 to vector<32x128xf32>
    %25 = arith.addf %24, %23 : vector<32x128xf32>
    %26 = arith.divf %24, %25 : vector<32x128xf32>
    %27 = arith.subf %18, %0 : vector<32x128xf32>
    %28 = arith.mulf %26, %27 : vector<32x128xf32>
    %29 = arith.addf %0, %28 : vector<32x128xf32>
    %c1 = arith.constant 1 : index
    %c0_20 = arith.constant 0 : index
    %c0_21 = arith.constant 0 : index
    %30 = vector.load %arg2[%c1, %c0_20, %c0_21] : memref<2x128x128xf32, #tpu.memory_space<vmem>>, vector<1x128x128xf32>
    %31 = vector.shape_cast %30 : vector<1x128x128xf32> to vector<128x128xf32>
    %c1_22 = arith.constant 1 : index
    %c0_23 = arith.constant 0 : index
    %c0_24 = arith.constant 0 : index
    %32 = vector.load %arg3[%c1_22, %c0_23, %c0_24] : memref<2x128x128xf32, #tpu.memory_space<vmem>>, vector<1x128x128xf32>
    %33 = vector.shape_cast %32 : vector<1x128x128xf32> to vector<128x128xf32>
    %c1_25 = arith.constant 1 : index
    %c0_26 = arith.constant 0 : index
    %c0_27 = arith.constant 0 : index
    %34 = vector.load %arg4[%c1_25, %c0_26, %c0_27] : memref<2x128x128xf32, #tpu.memory_space<vmem>>, vector<1x128x128xf32>
    %35 = vector.shape_cast %34 : vector<1x128x128xf32> to vector<128x128xf32>
    %c1_28 = arith.constant 1 : index
    %c0_29 = arith.constant 0 : index
    %c0_30 = arith.constant 0 : index
    %36 = vector.load %arg5[%c1_28, %c0_29, %c0_30] : memref<2x128x128xf32, #tpu.memory_space<vmem>>, vector<1x128x128xf32>
    %37 = vector.shape_cast %36 : vector<1x128x128xf32> to vector<128x128xf32>
    %cst_31 = arith.constant dense<0.000000e+00> : vector<32x128xf32>
    %38 = tpu.matmul %29, %31, %cst_31 {dimension_numbers = #tpu.dot_dimension_numbers<[1], [0], [0], [1], [0, 0, 1, 1], [], []>} : vector<32x128xf32>, vector<128x128xf32>, vector<32x128xf32> -> vector<32x128xf32>
    %cst_32 = arith.constant 5.000000e-01 : f32
    %39 = vector.broadcast %cst_32 : f32 to vector<32x128xf32>
    %40 = arith.mulf %39, %38 : vector<32x128xf32>
    %cst_33 = arith.constant 0.707106769 : f32
    %41 = vector.broadcast %cst_33 : f32 to vector<32x128xf32>
    %42 = arith.mulf %38, %41 : vector<32x128xf32>
    %43 = math.erf %42 : vector<32x128xf32>
    %cst_34 = arith.constant 1.000000e+00 : f32
    %44 = vector.broadcast %cst_34 : f32 to vector<32x128xf32>
    %45 = arith.addf %44, %43 : vector<32x128xf32>
    %46 = arith.mulf %40, %45 : vector<32x128xf32>
    %cst_35 = arith.constant dense<0.000000e+00> : vector<32x128xf32>
    %47 = tpu.matmul %46, %33, %cst_35 {dimension_numbers = #tpu.dot_dimension_numbers<[1], [0], [0], [1], [0, 0, 1, 1], [], []>} : vector<32x128xf32>, vector<128x128xf32>, vector<32x128xf32> -> vector<32x128xf32>
    %cst_36 = arith.constant dense<0.000000e+00> : vector<32x128xf32>
    %48 = tpu.matmul %47, %35, %cst_36 {dimension_numbers = #tpu.dot_dimension_numbers<[1], [0], [0], [1], [0, 0, 1, 1], [], []>} : vector<32x128xf32>, vector<128x128xf32>, vector<32x128xf32> -> vector<32x128xf32>
    %cst_37 = arith.constant dense<0.000000e+00> : vector<32x128xf32>
    %49 = tpu.matmul %29, %37, %cst_37 {dimension_numbers = #tpu.dot_dimension_numbers<[1], [0], [0], [1], [0, 0, 1, 1], [], []>} : vector<32x128xf32>, vector<128x128xf32>, vector<32x128xf32> -> vector<32x128xf32>
    %50 = arith.addf %48, %49 : vector<32x128xf32>
    %51 = arith.negf %50 : vector<32x128xf32>
    %52 = math.exp %51 : vector<32x128xf32>
    %cst_38 = arith.constant 1.000000e+00 : f32
    %53 = vector.broadcast %cst_38 : f32 to vector<32x128xf32>
    %54 = arith.addf %53, %52 : vector<32x128xf32>
    %55 = arith.divf %53, %54 : vector<32x128xf32>
    %56 = arith.subf %47, %29 : vector<32x128xf32>
    %57 = arith.mulf %55, %56 : vector<32x128xf32>
    %58 = arith.addf %29, %57 : vector<32x128xf32>
    %c0_39 = arith.constant 0 : index
    %c0_40 = arith.constant 0 : index
    %59 = vector.load %arg6[%c0_39, %c0_40] : memref<128x128xf32, #tpu.memory_space<vmem>>, vector<128x128xf32>
    %cst_41 = arith.constant dense<0.000000e+00> : vector<32x128xf32>
    %60 = tpu.matmul %58, %59, %cst_41 {dimension_numbers = #tpu.dot_dimension_numbers<[1], [0], [0], [1], [0, 0, 1, 1], [], []>} : vector<32x128xf32>, vector<128x128xf32>, vector<32x128xf32> -> vector<32x128xf32>
    %c0_42 = arith.constant 0 : index
    %c0_43 = arith.constant 0 : index
    %61 = vector.load %arg7[%c0_42, %c0_43] : memref<32x128xf32, #tpu.memory_space<vmem>>, vector<32x128xf32>
    tpu.vector_store %arg7[%c0_42, %c0_43], %60 {strides = array<i32>} : memref<32x128xf32, #tpu.memory_space<vmem>>, vector<32x128xf32>,
    return
  }
  func.func @transform_0(%arg0: i32) -> (i32, i32) {
    %c0_i32 = arith.constant 0 : i32
    %c0_i32_0 = arith.constant 0 : i32
    return %arg0, %c0_i32 : i32, i32
  }
  func.func @transform_1(%arg0: i32) -> (i32, i32, i32) {
    %c0_i32 = arith.constant 0 : i32
    %c0_i32_0 = arith.constant 0 : i32
    %c0_i32_1 = arith.constant 0 : i32
    %c0_i32_2 = arith.constant 0 : i32
    return %c0_i32, %c0_i32_0, %c0_i32_1 : i32, i32, i32
  }
  func.func @transform_2(%arg0: i32) -> (i32, i32, i32) {
    %c0_i32 = arith.constant 0 : i32
    %c0_i32_0 = arith.constant 0 : i32
    %c0_i32_1 = arith.constant 0 : i32
    %c0_i32_2 = arith.constant 0 : i32
    return %c0_i32, %c0_i32_0, %c0_i32_1 : i32, i32, i32
  }
  func.func @transform_3(%arg0: i32) -> (i32, i32, i32) {
    %c0_i32 = arith.constant 0 : i32
    %c0_i32_0 = arith.constant 0 : i32
    %c0_i32_1 = arith.constant 0 : i32
    %c0_i32_2 = arith.constant 0 : i32
    return %c0_i32, %c0_i32_0, %c0_i32_1 : i32, i32, i32
  }
  func.func @transform_4(%arg0: i32) -> (i32, i32, i32) {
    %c0_i32 = arith.constant 0 : i32
    %c0_i32_0 = arith.constant 0 : i32
    %c0_i32_1 = arith.constant 0 : i32
    %c0_i32_2 = arith.constant 0 : i32
    return %c0_i32, %c0_i32_0, %c0_i32_1 : i32, i32, i32
  }
  func.func @transform_5(%arg0: i32) -> (i32, i32) {
    %c0_i32 = arith.constant 0 : i32
    %c0_i32_0 = arith.constant 0 : i32
    %c0_i32_1 = arith.constant 0 : i32
    return %c0_i32, %c0_i32_0 : i32, i32
  }
  func.func @transform_6(%arg0: i32) -> (i32, i32) {
    %c0_i32 = arith.constant 0 : i32
    %c0_i32_0 = arith.constant 0 : i32
    return %arg0, %c0_i32 : i32, i32
  }
}

</mosaic_0001>

<bundles_post_ra>
// kernel: tpu_custom_call.1
= control target key start
LH: loop header
LB: loop body
LE: loop exit
PB: predicated region body
PF: predicated region fallthrough
CT: control target
= control target key end

     0   :  { %11 = vsyncpa [#allocation3], 0  ;;  %s1740_s0 = inlined_call_operand.hbm [shape: f32[32,128], index: 0, kind: input, shape index: {}]   ;;  %s1741_s1 = inlined_call_operand.hbm [shape: f32[2,128,128], index: 1, kind: input, shape index: {}]   ;;  %s1742_s2 = inlined_call_operand.hbm [shape: f32[2,128,128], index: 2, kind: input, shape index: {}]   ;;  %s1743_s3 = inlined_call_operand.hbm [shape: f32[2,128,128], index: 3, kind: input, shape index: {}]   ;;  %s1744_s4 = inlined_call_operand.hbm [shape: f32[2,128,128], index: 4, kind: input, shape index: {}]   ;;  %s1745_s5 = inlined_call_operand.hbm [shape: f32[128,128], index: 5, kind: input, shape index: {}]   ;;  %s1746_s6 = inlined_call_operand.hbm [shape: f32[32,128], index: 6, kind: output, shape index: {}]  }
   0x1   :  { %12 = vsyncpa [#allocation6], 0 }
   0x2   :  { %13 = vsyncpa [#allocation9], 0 }
   0x3   :  { %14 = vsyncpa [#allocation12], 0 }
   0x4   :  { %15 = vsyncpa [#allocation4], 0  ;;  %s33_s23 = sshll.u32 %s1741_s1, 4  ;;  %s1384_s24 = smov [#allocation5]   ;;  %s34_s23 = int_to_ptr.hbm [resolvable:$true] %s33_s23 }
   0x5   :  { %s35_s25 = sshll.u32 %s1384_s24, 4  ;;  %s59_s28 = sshll.u32 %s1743_s3, 4  ;;  %s36_s25 = int_to_ptr.vmem [resolvable:$true] %s35_s25  ;;  %s60_s28 = int_to_ptr.hbm [resolvable:$true] %s59_s28 }
   0x6   :  { %s1385_s29 = smov 128   ;;  %s1386_s30 = smov 8  }
   0x7   :  { %41 = dma.hbm_to_vmem [thread:$0]  %s34_s23, 4096, %s36_s25, [#allocation6], %s1385_s29, %s1385_s29, %s1386_s30  }
   0x8   :  { %s1387_s7 = smov [#allocation8]   ;;  %s20_s1 = sshll.u32 %s1740_s0, 4  ;;  %s21_s1 = int_to_ptr.hbm [resolvable:$true] %s20_s1 }
   0x9   :  { %s61_s8 = sshll.u32 %s1387_s7, 4  ;;  %s46_s12 = sshll.u32 %s1742_s2, 4  ;;  %s62_s8 = int_to_ptr.vmem [resolvable:$true] %s61_s8  ;;  %s47_s12 = int_to_ptr.hbm [resolvable:$true] %s46_s12 }
   0xa   :  { %67 = dma.hbm_to_vmem [thread:$0]  %s60_s28, 4096, %s62_s8, [#allocation9], %s1385_s29, %s1385_s29, %s1386_s30  }
   0xb   :  { %s1388_s13 = smov [#allocation2]   ;;  %s1389_s15 = smov [#allocation7]  }
   0xc   :  { %s22_s14 = sshll.u32 %s1388_s13, 4  ;;  %s48_s0 = sshll.u32 %s1389_s15, 4  ;;  %s23_s14 = int_to_ptr.vmem [resolvable:$true] %s22_s14  ;;  %s49_s0 = int_to_ptr.vmem [resolvable:$true] %s48_s0 }
   0xd   :  { %28 = dma.hbm_to_vmem [thread:$0]  %s21_s1, 512, %s23_s14, [#allocation3], %s1385_s29, %s1385_s29, %s1386_s30  }
   0xe   :  { %s72_s18 = sshll.u32 %s1744_s4, 4  ;;  %s85_s20 = sshll.u32 %s1745_s5, 4  ;;  %s73_s18 = int_to_ptr.hbm [resolvable:$true] %s72_s18  ;;  %s86_s20 = int_to_ptr.hbm [resolvable:$true] %s85_s20 }
   0xf   :  { %54 = dma.hbm_to_vmem [thread:$0]  %s47_s12, 4096, %s49_s0, [#allocation6], %s1385_s29, %s1385_s29, %s1386_s30  }
  0x10   :  { %s1390_s21 = smov [#allocation10]   ;;  %s1391_s23 = smov [#allocation11]  }
  0x11   :  { %s74_s22 = sshll.u32 %s1390_s21, 4  ;;  %s87_s4 = sshll.u32 %s1391_s23, 4  ;;  %s75_s22 = int_to_ptr.vmem [resolvable:$true] %s74_s22  ;;  %s88_s4 = int_to_ptr.vmem [resolvable:$true] %s87_s4 }
  0x12   :  { %80 = dma.hbm_to_vmem [thread:$0]  %s73_s18, 4096, %s75_s22, [#allocation9], %s1385_s29, %s1385_s29, %s1386_s30  }
  0x13   :  { %93 = dma.hbm_to_vmem [thread:$0]  %s86_s20, 2048, %s88_s4, [#allocation12], %s1385_s29, %s1385_s29, %s1386_s30  }
  0x14   :  { %1374 = dma.done.wait [#allocation3], 512  }
  0x15   :  { %1375 = vsyncadd [#allocation3], 4294966784 }
  0x16   :  { %1376 = dma.done.wait [#allocation6], 8192  }
  0x17   :  { %1377 = vsyncadd [#allocation6], 4294959104 }
  0x18   :  { %1378 = dma.done.wait [#allocation9], 8192  }
  0x19   :  { %1379 = vsyncadd [#allocation9], 4294959104 }
  0x1a   :  { %1380 = dma.done.wait [#allocation12], 2048  }
  0x1b   :  { %1381 = vsyncadd [#allocation12], 4294965248  ;;  %v137_v0 = vld [vmem:[#allocation5 + $0x78] sm:$0xff]  ;;  %v136_v1 = vld [vmem:[#allocation5 + $0x70] sm:$0xff]  ;;  %s1392_s5 = smov [#allocation13]   ;;  %s1069_s27 = sshll.u32 %s1746_s6, 4  ;;  %s1070_s27 = int_to_ptr.hbm [resolvable:$true] %s1069_s27 }
  0x1c   :  { %186 = vmatpush.msra.mxu0 %v137_v0  ;;  %v135_v2 = vld [vmem:[#allocation5 + $0x68] sm:$0xff]  ;;  %v134_v3 = vld [vmem:[#allocation5 + $0x60] sm:$0xff]  ;;  %v133_v4 = vld [vmem:[#allocation5 + $0x58] sm:$0xff]  ;;  %s1067_s24 = sshll.u32 %s1392_s5, 4  ;;  %s1068_s24 = int_to_ptr.vmem [resolvable:$true] %s1067_s24 }
  0x1d   :  { %v132_v5 = vld [vmem:[#allocation5 + $0x50] sm:$0xff]  ;;  %v131_v6 = vld [vmem:[#allocation5 + $0x48] sm:$0xff]  ;;  %v130_v7 = vld [vmem:[#allocation5 + $0x40] sm:$0xff] }
  0x1e   :  { %187 = vmatpush.msra.mxu0 %v136_v1  ;;  %v129_v8 = vld [vmem:[#allocation5 + $0x38] sm:$0xff]  ;;  %v128_v9 = vld [vmem:[#allocation5 + $0x30] sm:$0xff]  ;;  %v127_v10 = vld [vmem:[#allocation5 + $0x28] sm:$0xff] }
  0x1f   :  { %v126_v11 = vld [vmem:[#allocation5 + $0x20] sm:$0xff]  ;;  %v125_v12 = vld [vmem:[#allocation5 + $0x18] sm:$0xff]  ;;  %v124_v13 = vld [vmem:[#allocation5 + $0x10] sm:$0xff] }
  0x20   :  { %188 = vmatpush.msra.mxu0 %v135_v2  ;;  %v123_v14 = vld [vmem:[#allocation5 + $0x8] sm:$0xff]  ;;  %v122_v15 = vld [vmem:[#allocation5] sm:$0xff]  ;;  %v1470_v18 = vld [vmem:[#allocation2 + $0x10] sm:$0xff] }
  0x21   :  { %v1464_v16 = vld [vmem:[#allocation2] sm:$0xff]  ;;  %v1467_v17 = vld [vmem:[#allocation2 + $0x8] sm:$0xff]  ;;  %v1473_v19 = vld [vmem:[#allocation2 + $0x18] sm:$0xff] }
  0x22   :  { %189 = vmatpush.msra.mxu0 %v134_v3  ;;  %v153_v20 = vld [vmem:[#allocation7 + $0x78] sm:$0xff]  ;;  %v152_v21 = vld [vmem:[#allocation7 + $0x70] sm:$0xff]  ;;  %v151_v22 = vld [vmem:[#allocation7 + $0x68] sm:$0xff] }
  0x23   :  { %391 = vmatpush.msra.mxu1 %v153_v20  ;;  %v150_v23 = vld [vmem:[#allocation7 + $0x60] sm:$0xff]  ;;  %v149_v24 = vld [vmem:[#allocation7 + $0x58] sm:$0xff]  ;;  %v148_v25 = vld [vmem:[#allocation7 + $0x50] sm:$0xff] }
  0x24   :  { %190 = vmatpush.msra.mxu0 %v133_v4  ;;  %v147_v28 = vld [vmem:[#allocation7 + $0x48] sm:$0xff]  ;;  %v146_v30 = vld [vmem:[#allocation7 + $0x40] sm:$0xff]  ;;  %v145_v32 = vld [vmem:[#allocation7 + $0x38] sm:$0xff] }
  0x25   :  { %392 = vmatpush.msra.mxu1 %v152_v21  ;;  %v144_v34 = vld [vmem:[#allocation7 + $0x30] sm:$0xff]  ;;  %v143_v39 = vld [vmem:[#allocation7 + $0x28] sm:$0xff]  ;;  %v142_v43 = vld [vmem:[#allocation7 + $0x20] sm:$0xff] }
  0x26   :  { %191 = vmatpush.msra.mxu0 %v132_v5  ;;  %v141_v47 = vld [vmem:[#allocation7 + $0x18] sm:$0xff]  ;;  %v140_v50 = vld [vmem:[#allocation7 + $0x10] sm:$0xff]  ;;  %v139_v56 = vld [vmem:[#allocation7 + $0x8] sm:$0xff] }
  0x27   :  { %393 = vmatpush.msra.mxu1 %v151_v22  ;;  %v138_v61 = vld [vmem:[#allocation7] sm:$0xff] }
  0x28   :  { %192 = vmatpush.msra.mxu0 %v131_v6 }
  0x29   :  { %394 = vmatpush.msra.mxu1 %v150_v23 }
  0x2a   :  { %193 = vmatpush.msra.mxu0 %v130_v7 }
  0x2b   :  { %395 = vmatpush.msra.mxu1 %v149_v24 }
  0x2c   :  { %194 = vmatpush.msra.mxu0 %v129_v8 }
  0x2d   :  { %396 = vmatpush.msra.mxu1 %v148_v25 }
  0x2e   :  { %195 = vmatpush.msra.mxu0 %v128_v9 }
  0x2f   :  { %397 = vmatpush.msra.mxu1 %v147_v28 }
  0x30   :  { %196 = vmatpush.msra.mxu0 %v127_v10 }
  0x31   :  { %398 = vmatpush.msra.mxu1 %v146_v30 }
  0x32   :  { %197 = vmatpush.msra.mxu0 %v126_v11 }
  0x33   :  { %399 = vmatpush.msra.mxu1 %v145_v32 }
  0x34   :  { %198 = vmatpush.msra.mxu0 %v125_v12 }
  0x35   :  { %400 = vmatpush.msra.mxu1 %v144_v34 }
  0x36   :  { %199 = vmatpush.msra.mxu0 %v124_v13 }
  0x37   :  { %401 = vmatpush.msra.mxu1 %v143_v39 }
  0x38   :  { %200 = vmatpush.msra.mxu0 %v123_v14 }
  0x39   :  { %402 = vmatpush.msra.mxu1 %v142_v43 }
  0x3a   :  { %201 = vmatpush.msra.mxu0 %v122_v15 }
  0x3b   :  { %202 = vmatmul.f32.vlgmr.msra.gmra.mxu0 %v1464_v16  ;;  %403 = vmatpush.msra.mxu1 %v141_v47 }
  0x3d   :  { %404 = vmatpush.msra.mxu1 %v140_v50 }
  0x3f   :  { %405 = vmatpush.msra.mxu1 %v139_v56 }
  0x41   :  { %406 = vmatpush.msra.mxu1 %v138_v61 }
  0x43   :  { %205 = vmatmul.f32.gmra.mxu0 %v1467_v17 }
  0x4b   :  { %208 = vmatmul.f32.gmra.mxu0 %v1470_v18 }
  0x53   :  { %211 = vmatmul.f32.gmra.mxu0 %v1473_v19 }
  0xb8   :  { %v1476_v26 = vpop.f32.mrf.mxu0 }
  0xb9   :  { %v1479_v27 = vmul.f32 0.70710677, %v1476_v26 }
  0xbb   :  { %v223_v29 = vmul.f32 %v1479_v27, %v1479_v27 }
  0xbd   :  { %v1483_v31 = vmin.f32 %v223_v29, 16.0 }
  0xbf   :  { %v225_v33 = vmul.f32 2.1237322e-06, %v1483_v31  ;;  %v236_v35 = vmul.f32 3.8918573e-05, %v1483_v31 }
  0xc0   :  { %v1487_v36 = vpop.f32.mrf.mxu0 }
  0xc1   :  { %v226_v37 = vadd.f32 0.00028619796, %v225_v33  ;;  %v1490_v38 = vmul.f32 0.70710677, %v1487_v36  ;;  %v237_v40 = vadd.f32 0.001143296, %v236_v35 }
  0xc3   :  { %v227_v41 = vmul.f32 %v226_v37, %v1483_v31  ;;  %v263_v42 = vmul.f32 %v1490_v38, %v1490_v38  ;;  %v238_v44 = vmul.f32 %v237_v40, %v1483_v31 }
  0xc5   :  { %v228_v45 = vadd.f32 0.0036580483, %v227_v41  ;;  %v1496_v46 = vmin.f32 %v263_v42, 16.0  ;;  %v239_v48 = vadd.f32 0.014752088, %v238_v44 }
  0xc7   :  { %v265_v49 = vmul.f32 2.1237322e-06, %v1496_v46  ;;  %v276_v51 = vmul.f32 3.8918573e-05, %v1496_v46  ;;  %v240_v53 = vmul.f32 %v239_v48, %v1483_v31  ;;  %v229_v54 = vmul.f32 %v228_v45, %v1483_v31 }
  0xc8   :  { %v1500_v52 = vpop.f32.mrf.mxu0 }
  0xc9   :  { %v266_v55 = vadd.f32 0.00028619796, %v265_v49  ;;  %v1505_v57 = vmul.f32 0.70710677, %v1500_v52  ;;  %v241_v58 = vadd.f32 0.112945676, %v240_v53 }
  0xca   :  { %v277_v59 = vadd.f32 0.001143296, %v276_v51  ;;  %v230_v1 = vadd.f32 0.05243302, %v229_v54 }
  0xcb   :  { %v267_v60 = vmul.f32 %v266_v55, %v1496_v46  ;;  %v303_v62 = vmul.f32 %v1505_v57, %v1505_v57  ;;  %v242_v63 = vmul.f32 %v241_v58, %v1483_v31 }
  0xcc   :  { %v278_v0 = vmul.f32 %v277_v59, %v1496_v46  ;;  %v231_v11 = vmul.f32 %v230_v1, %v1483_v31 }
  0xcd   :  { %v268_v2 = vadd.f32 0.0036580483, %v267_v60  ;;  %v1512_v3 = vmin.f32 %v303_v62, 16.0  ;;  %v243_v4 = vadd.f32 0.4994258, %v242_v63 }
  0xce   :  { %v279_v5 = vadd.f32 0.014752088, %v278_v0  ;;  %v232_v24 = vadd.f32 0.18741608, %v231_v11 }
  0xcf   :  { %v305_v6 = vmul.f32 2.1237322e-06, %v1512_v3  ;;  %v244_v8 = vmul.f32 %v243_v4, %v1483_v31  ;;  %v316_v10 = vmul.f32 3.8918573e-05, %v1512_v3  ;;  %v269_v12 = vmul.f32 %v268_v2, %v1496_v46 }
  0xd0   :  { %v1515_v7 = vpop.f32.mrf.mxu0  ;;  %v280_v9 = vmul.f32 %v279_v5, %v1496_v46  ;;  %v233_v39 = vmul.f32 %v232_v24, %v1483_v31 }
  0xd1   :  { %v306_v13 = vadd.f32 0.00028619796, %v305_v6  ;;  %v1523_v14 = vmul.f32 0.70710677, %v1515_v7  ;;  %v245_v15 = vadd.f32 1.0, %v244_v8 }
  0xd2   :  { %v281_v20 = vadd.f32 0.112945676, %v280_v9  ;;  %v317_v21 = vadd.f32 0.001143296, %v316_v10  ;;  %v270_v28 = vadd.f32 0.05243302, %v269_v12 }
  0xd3   :  { %v307_v22 = vmul.f32 %v306_v13, %v1512_v3  ;;  %v343_v23 = vmul.f32 %v1523_v14, %v1523_v14  ;;  %1158 = vrcp.f32 %v245_v15  ;;  %v234_v54 = vadd.f32 1.1283791, %v233_v39 }
  0xd4   :  { %v282_v25 = vmul.f32 %v281_v20, %v1496_v46  ;;  %v318_v30 = vmul.f32 %v317_v21, %v1512_v3  ;;  %v271_v42 = vmul.f32 %v270_v28, %v1496_v46  ;;  %v257_v56 = vand.u32 2147483648, %v245_v15 }
  0xd5   :  { %v1529_v29 = vmin.f32 %v343_v23, 16.0  ;;  %v308_v32 = vadd.f32 0.0036580483, %v307_v22  ;;  %v255_v60 = vand.u32 2147483647, %v245_v15  ;;  %vm251_vm1 = vweird.f32 %v245_v15 }
  0xd6   :  { %v283_v33 = vadd.f32 0.4994258, %v282_v25  ;;  %v319_v35 = vadd.f32 0.014752088, %v318_v30  ;;  %v272_v55 = vadd.f32 0.18741608, %v271_v42  ;;  %v235_v9 = vmul.f32 %v234_v54, %v1479_v27 }
  0xd7   :  { %v345_v34 = vmul.f32 2.1237322e-06, %v1529_v29  ;;  %v356_v37 = vmul.f32 3.8918573e-05, %v1529_v29  ;;  %v309_v49 = vmul.f32 %v308_v32, %v1512_v3  ;;  %v258_v5 = vor.u32 1.1754944e-38, %v257_v56  ;;  %v168_v42 = vld [vmem:[#allocation8 + $0x70] sm:$0xff] }
  0xd8   :  { %v284_v40 = vmul.f32 %v283_v33, %v1496_v46  ;;  %v320_v44 = vmul.f32 %v319_v35, %v1512_v3  ;;  %v273_v4 = vmul.f32 %v272_v55, %v1496_v46  ;;  %vm256_vm3 = vcmp.eq.f32.partialorder %v255_v60, 8.507059e+37  ;;  %v169_v35 = vld [vmem:[#allocation8 + $0x78] sm:$0xff] }
  0xd9   :  { %v1159_v41 = vpop.eup %1158  ;;  %v346_v43 = vadd.f32 0.00028619796, %v345_v34  ;;  %v357_v45 = vadd.f32 0.001143296, %v356_v37  ;;  %v310_v62 = vadd.f32 0.05243302, %v309_v49  ;;  %449 = vmatpush.msra.mxu3 %v169_v35 }
  0xda   :  { %v247_v47 = vmul.f32 %v1159_v41, %v245_v15  ;;  %v1538_v48 = vadd.f32 1.0, %v284_v40  ;;  %v321_v50 = vadd.f32 0.112945676, %v320_v44  ;;  %vm252_vm0 = vweird.f32 %v1159_v41  ;;  %v185_v34 = vld [vmem:[#allocation10 + $0x78] sm:$0xff]  ;;  %v184_v37 = vld [vmem:[#allocation10 + $0x70] sm:$0xff]  ;;  %v167_v49 = vld [vmem:[#allocation8 + $0x68] sm:$0xff] }
  0xdb   :  { %v358_v51 = vmul.f32 %v357_v45, %v1529_v29  ;;  %v347_v53 = vmul.f32 %v346_v43, %v1529_v29  ;;  %vm253_vm2 = vmor %vm251_vm1, %vm252_vm0  ;;  %v311_v12 = vmul.f32 %v310_v62, %v1512_v3  ;;  %v274_v23 = vadd.f32 1.1283791, %v273_v4  ;;  %420 = vmatpush.msra.mxu2 %v185_v34  ;;  %v183_v45 = vld [vmem:[#allocation10 + $0x68] sm:$0xff]  ;;  %450 = vmatpush.msra.mxu3 %v168_v42 }
  0xdc   :  { %v248_v31 = vsub.f32 1.0, %v247_v47  ;;  %1160 = vrcp.f32 %v1538_v48  ;;  %v322_v58 = vmul.f32 %v321_v50, %v1512_v3  ;;  %v295_v27 = vand.u32 2147483647, %v1538_v48  ;;  %v159_v42 = vld [vmem:[#allocation8 + $0x28] sm:$0xff] }
  0xdd   :  { %v359_v61 = vadd.f32 0.014752088, %v358_v51  ;;  %v348_v0 = vadd.f32 0.0036580483, %v347_v53  ;;  %v297_v28 = vand.u32 2147483648, %v1538_v48  ;;  %v215_v30 = vmul.f32 0.5, %v1476_v26  ;;  %421 = vmatpush.msra.mxu2 %v184_v37  ;;  %451 = vmatpush.msra.mxu3 %v167_v49 }
  0xde   :  { %v249_v59 = vmul.f32 %v1159_v41, %v248_v31  ;;  %v323_v63 = vadd.f32 0.4994258, %v322_v58  ;;  %v312_v39 = vadd.f32 0.18741608, %v311_v12  ;;  %vm291_vm5 = vweird.f32 %v1538_v48  ;;  %v182_v31 = vld [vmem:[#allocation10 + $0x60] sm:$0xff] }
  0xdf   :  { %v360_v2 = vmul.f32 %v359_v61, %v1529_v29  ;;  %v349_v15 = vmul.f32 %v348_v0, %v1529_v29  ;;  %v298_v26 = vor.u32 1.1754944e-38, %v297_v28  ;;  %v275_v50 = vmul.f32 %v274_v23, %v1490_v38  ;;  %422 = vmatpush.msra.mxu2 %v183_v45  ;;  %v166_v58 = vld [vmem:[#allocation8 + $0x60] sm:$0xff]  ;;  %v181_v38 = vld [vmem:[#allocation10 + $0x58] sm:$0xff] }
  0xe0   :  { %v250_v1 = vadd.f32 %v1159_v41, %v249_v59  ;;  %v324_v6 = vmul.f32 %v323_v63, %v1512_v3  ;;  %vm296_vm7 = vcmp.eq.f32.partialorder %v295_v27, 8.507059e+37  ;;  %v165_v61 = vld [vmem:[#allocation8 + $0x58] sm:$0xff]  ;;  %v216_v62 = vmul.f32 0.5, %v1487_v36  ;;  %452 = vmatpush.msra.mxu3 %v166_v58  ;;  %v162_v23 = vld [vmem:[#allocation8 + $0x40] sm:$0xff]  ;;  %v171_v58 = vld [vmem:[#allocation10 + $0x8] sm:$0xff] }
  0xe1   :  { %v361_v11 = vadd.f32 0.112945676, %v360_v2  ;;  %v350_v40 = vadd.f32 0.05243302, %v349_v15  ;;  %423 = vmatpush.msra.mxu2 %v182_v31  ;;  %v177_v27 = vld [vmem:[#allocation10 + $0x38] sm:$0xff] }
  0xe2   :  { %v1161_v8 = vpop.eup %1160  ;;  %v254_v10 = vsel %vm253_vm2, %v1159_v41, %v250_v1  ;;  %v1552_v22 = vadd.f32 1.0, %v324_v6  ;;  %453 = vmatpush.msra.mxu3 %v165_v61  ;;  %v170_v61 = vld [vmem:[#allocation10] sm:$0xff] }
  0xe3   :  { %v259_v13 = vsel %vm256_vm3, %v258_v5, %v254_v10  ;;  %v287_v20 = vmul.f32 %v1161_v8, %v1538_v48  ;;  %v362_v46 = vmul.f32 %v361_v11, %v1529_v29  ;;  %vm292_vm4 = vweird.f32 %v1161_v8  ;;  %424 = vmatpush.msra.mxu2 %v181_v38  ;;  %v164_v5 = vld [vmem:[#allocation8 + $0x50] sm:$0xff]  ;;  %v179_v10 = vld [vmem:[#allocation10 + $0x48] sm:$0xff] }
  0xe4   :  { %v260_v21 = vmul.f32 %v259_v13, %v235_v9  ;;  %1162 = vrcp.f32 %v1552_v22  ;;  %vm293_vm6 = vmor %vm291_vm5, %vm292_vm4  ;;  %v313_v48 = vmul.f32 %v312_v39, %v1512_v3  ;;  %v351_v55 = vmul.f32 %v350_v40, %v1529_v29  ;;  %v180_v3 = vld [vmem:[#allocation10 + $0x50] sm:$0xff]  ;;  %v163_v11 = vld [vmem:[#allocation8 + $0x48] sm:$0xff]  ;;  %454 = vmatpush.msra.mxu3 %v164_v5 }
  0xe5   :  { %v288_v24 = vsub.f32 1.0, %v287_v20  ;;  %v363_v33 = vadd.f32 0.4994258, %v362_v46  ;;  %v337_v4 = vand.u32 2147483648, %v1552_v22  ;;  %v335_v9 = vand.u32 2147483647, %v1552_v22  ;;  %425 = vmatpush.msra.mxu2 %v180_v3 }
  0xe6   :  { %v1085_v25 = vclamps-f32 %v260_v21, 1.0  ;;  %v314_v1 = vadd.f32 1.1283791, %v313_v48  ;;  %v352_v2 = vadd.f32 0.18741608, %v351_v55  ;;  %vm331_vm9 = vweird.f32 %v1552_v22  ;;  %v178_v20 = vld [vmem:[#allocation10 + $0x40] sm:$0xff]  ;;  %455 = vmatpush.msra.mxu3 %v163_v11 }
  0xe7   :  { %v289_v32 = vmul.f32 %v1161_v8, %v288_v24  ;;  %v364_v44 = vmul.f32 %v363_v33, %v1529_v29  ;;  %v338_v21 = vor.u32 1.1754944e-38, %v337_v4  ;;  %426 = vmatpush.msra.mxu2 %v179_v10  ;;  %vm336_vm11 = vcmp.eq.f32.partialorder %v335_v9, 8.507059e+37  ;;  %v176_v33 = vld [vmem:[#allocation10 + $0x30] sm:$0xff]  ;;  %v175_v40 = vld [vmem:[#allocation10 + $0x28] sm:$0xff]  ;;  %v157_v48 = vld [vmem:[#allocation8 + $0x18] sm:$0xff] }
  0xe8   :  { %v383_v41 = vadd.f32 1.0, %v1085_v25  ;;  %v353_v15 = vmul.f32 %v352_v2, %v1529_v29  ;;  %v315_v24 = vmul.f32 %v314_v1, %v1505_v57  ;;  %456 = vmatpush.msra.mxu3 %v162_v23  ;;  %v160_v57 = vld [vmem:[#allocation8 + $0x30] sm:$0xff]  ;;  %v582_v1 = vld [vmem:[#allocation5 + $0xf8] sm:$0xff]  ;;  %v579_v9 = vld [vmem:[#allocation5 + $0xe0] sm:$0xff] }
  0xe9   :  { %v290_v43 = vadd.f32 %v1161_v8, %v289_v32  ;;  %v1563_v53 = vadd.f32 1.0, %v364_v44  ;;  %427 = vmatpush.msra.mxu2 %v178_v20  ;;  %v633_v2 = vld [vmem:[#allocation10 + $0xf8] sm:$0xff]  ;;  %634 = vmatpush.msrb.mxu0 %v582_v1  ;;  %v581_v4 = vld [vmem:[#allocation5 + $0xf0] sm:$0xff]  ;;  %v630_v10 = vld [vmem:[#allocation10 + $0xe0] sm:$0xff] }
  0xea   :  { %v387_v47 = vmul.f32 %v383_v41, %v215_v30  ;;  %v1163_v54 = vpop.eup %1162  ;;  %v354_v34 = vadd.f32 1.1283791, %v353_v15  ;;  %v632_v5 = vld [vmem:[#allocation10 + $0xf0] sm:$0xff]  ;;  %v578_v11 = vld [vmem:[#allocation5 + $0xd8] sm:$0xff]  ;;  %v576_v20 = vld [vmem:[#allocation5 + $0xc8] sm:$0xff] }
  0xeb   :  { %v294_v51 = vsel %vm293_vm6, %v1161_v8, %v290_v43  ;;  %v327_v60 = vmul.f32 %v1163_v54, %v1552_v22  ;;  %1164 = vrcp.f32 %v1563_v53  ;;  %vm332_vm8 = vweird.f32 %v1163_v54  ;;  %v161_v22 = vld [vmem:[#allocation8 + $0x38] sm:$0xff]  ;;  %428 = vmatpush.msra.mxu2 %v177_v27  ;;  %635 = vmatpush.msrb.mxu0 %v581_v4  ;;  %v627_v15 = vld [vmem:[#allocation10 + $0xc8] sm:$0xff]  ;;  %v624_v27 = vld [vmem:[#allocation10 + $0xb0] sm:$0xff] }
  0xec   :  { %407 = vmatmul.f32.vlgmr.msra.gmra.mxu1 %v387_v47  ;;  %v299_v56 = vsel %vm296_vm7, %v298_v26, %v294_v51  ;;  %vm333_vm10 = vmor %vm331_vm9, %vm332_vm8  ;;  %v377_v29 = vand.u32 2147483648, %v1563_v53  ;;  %v375_v37 = vand.u32 2147483647, %v1563_v53  ;;  %457 = vmatpush.msra.mxu3 %v161_v22  ;;  %vm371_vm13 = vweird.f32 %v1563_v53  ;;  %v174_v47 = vld [vmem:[#allocation10 + $0x20] sm:$0xff]  ;;  %v574_v23 = vld [vmem:[#allocation5 + $0xb8] sm:$0xff] }
  0xed   :  { %v300_v59 = vmul.f32 %v299_v56, %v275_v50  ;;  %v328_v0 = vsub.f32 1.0, %v327_v60  ;;  %429 = vmatpush.msra.mxu2 %v176_v33  ;;  %v217_v43 = vmul.f32 0.5, %v1500_v52  ;;  %v355_v26 = vmul.f32 %v354_v34, %v1523_v14  ;;  %v158_v50 = vld [vmem:[#allocation8 + $0x20] sm:$0xff]  ;;  %v172_v52 = vld [vmem:[#allocation10 + $0x10] sm:$0xff]  ;;  %v155_v60 = vld [vmem:[#allocation8 + $0x8] sm:$0xff] }
  0xee   :  { %v378_v45 = vor.u32 1.1754944e-38, %v377_v29  ;;  %458 = vmatpush.msra.mxu3 %v160_v57  ;;  %vm376_vm15 = vcmp.eq.f32.partialorder %v375_v37, 8.507059e+37  ;;  %v156_v56 = vld [vmem:[#allocation8 + $0x10] sm:$0xff]  ;;  %v218_v14 = vmul.f32 0.5, %v1515_v7  ;;  %v623_v22 = vld [vmem:[#allocation10 + $0xa8] sm:$0xff]  ;;  %v622_v29 = vld [vmem:[#allocation10 + $0xa0] sm:$0xff] }
  0xef   :  { %v1086_v63 = vclamps-f32 %v300_v59, 1.0  ;;  %v329_v8 = vmul.f32 %v1163_v54, %v328_v0  ;;  %430 = vmatpush.msra.mxu2 %v175_v40  ;;  %v570_v33 = vld [vmem:[#allocation5 + $0x98] sm:$0xff]  ;;  %v569_v57 = vld [vmem:[#allocation5 + $0x90] sm:$0xff] }
  0xf0   :  { %459 = vmatpush.msra.mxu3 %v159_v42  ;;  %v621_v34 = vld [vmem:[#allocation10 + $0x98] sm:$0xff]  ;;  %v619_v42 = vld [vmem:[#allocation10 + $0x88] sm:$0xff] }
  0xf1   :  { %v384_v6 = vadd.f32 1.0, %v1086_v63  ;;  %v1165_v36 = vpop.eup %1164  ;;  %v330_v13 = vadd.f32 %v1163_v54, %v329_v8  ;;  %431 = vmatpush.msra.mxu2 %v174_v47  ;;  %v631_v8 = vld [vmem:[#allocation10 + $0xe8] sm:$0xff] }
  0xf2   :  { %v367_v46 = vmul.f32 %v1165_v36, %v1563_v53  ;;  %vm372_vm12 = vweird.f32 %v1165_v36  ;;  %460 = vmatpush.msra.mxu3 %v158_v50 }
  0xf3   :  { %v388_v12 = vmul.f32 %v384_v6, %v216_v62  ;;  %v334_v25 = vsel %vm333_vm10, %v1163_v54, %v330_v13  ;;  %vm373_vm14 = vmor %vm371_vm13, %vm372_vm12  ;;  %v173_v54 = vld [vmem:[#allocation10 + $0x18] sm:$0xff]  ;;  %v154_v62 = vld [vmem:[#allocation8] sm:$0xff] }
  0xf4   :  { %v339_v28 = vsel %vm336_vm11, %v338_v21, %v334_v25  ;;  %v368_v30 = vsub.f32 1.0, %v367_v46  ;;  %432 = vmatpush.msra.mxu2 %v173_v54  ;;  %461 = vmatpush.msra.mxu3 %v157_v48  ;;  %v580_v6 = vld [vmem:[#allocation5 + $0xe8] sm:$0xff]  ;;  %v628_v13 = vld [vmem:[#allocation10 + $0xd0] sm:$0xff]  ;;  %v575_v21 = vld [vmem:[#allocation5 + $0xc0] sm:$0xff] }
  0xf5   :  { %410 = vmatmul.f32.gmra.mxu1 %v388_v12  ;;  %v340_v32 = vmul.f32 %v339_v28, %v315_v24  ;;  %636 = vmatpush.msrb.mxu0 %v580_v6  ;;  %v577_v12 = vld [vmem:[#allocation5 + $0xd0] sm:$0xff]  ;;  %v626_v46 = vld [vmem:[#allocation10 + $0xc0] sm:$0xff]  ;;  %v625_v24 = vld [vmem:[#allocation10 + $0xb8] sm:$0xff] }
  0xf6   :  { %v369_v35 = vmul.f32 %v1165_v36, %v368_v30  ;;  %433 = vmatpush.msra.mxu2 %v172_v52  ;;  %462 = vmatpush.msra.mxu3 %v156_v56  ;;  %v573_v25 = vld [vmem:[#allocation5 + $0xb0] sm:$0xff]  ;;  %v572_v30 = vld [vmem:[#allocation5 + $0xa8] sm:$0xff] }
  0xf7   :  { %v1087_v39 = vclamps-f32 %v340_v32, 1.0  ;;  %637 = vmatpush.msrb.mxu0 %v579_v9  ;;  %v571_v32 = vld [vmem:[#allocation5 + $0xa0] sm:$0xff] }
  0xf8   :  { %v370_v41 = vadd.f32 %v1165_v36, %v369_v35  ;;  %434 = vmatpush.msra.mxu2 %v171_v58  ;;  %463 = vmatpush.msra.mxu3 %v155_v60 }
  0xf9   :  { %v385_v44 = vadd.f32 1.0, %v1087_v39  ;;  %638 = vmatpush.msrb.mxu0 %v578_v11  ;;  %v620_v39 = vld [vmem:[#allocation10 + $0x90] sm:$0xff] }
  0xfa   :  { %v374_v49 = vsel %vm373_vm14, %v1165_v36, %v370_v41  ;;  %435 = vmatpush.msra.mxu2 %v170_v61  ;;  %464 = vmatpush.msra.mxu3 %v154_v62  ;;  %v629_v36 = vld [vmem:[#allocation10 + $0xd8] sm:$0xff]  ;;  %v568_v41 = vld [vmem:[#allocation5 + $0x88] sm:$0xff] }
  0xfb   :  { %v389_v51 = vmul.f32 %v385_v44, %v217_v43  ;;  %v379_v31 = vsel %vm376_vm15, %v378_v45, %v374_v49  ;;  %436 = vmatmul.f32.vlgmr.msra.gmra.mxu2 %v1464_v16  ;;  %639 = vmatpush.msrb.mxu0 %v577_v12  ;;  %v567_v44 = vld [vmem:[#allocation5 + $0x80] sm:$0xff] }
  0xfc   :  { %v380_v53 = vmul.f32 %v379_v31, %v355_v26  ;;  %868 = vmatpush.msrb.mxu2 %v633_v2  ;;  %v618_v45 = vld [vmem:[#allocation10 + $0x80] sm:$0xff] }
  0xfd   :  { %413 = vmatmul.f32.gmra.mxu1 %v389_v51  ;;  %640 = vmatpush.msrb.mxu0 %v576_v20 }
  0xfe   :  { %v1088_v55 = vclamps-f32 %v380_v53, 1.0  ;;  %869 = vmatpush.msrb.mxu2 %v632_v5 }
  0xff   :  { %641 = vmatpush.msrb.mxu0 %v575_v21 }
 0x100   :  { %v386_v59 = vadd.f32 1.0, %v1088_v55  ;;  %870 = vmatpush.msrb.mxu2 %v631_v8 }
 0x101   :  { %642 = vmatpush.msrb.mxu0 %v574_v23 }
 0x102   :  { %v390_v38 = vmul.f32 %v386_v59, %v218_v14  ;;  %871 = vmatpush.msrb.mxu2 %v630_v10 }
 0x103   :  { %439 = vmatmul.f32.gmra.mxu2 %v1467_v17  ;;  %643 = vmatpush.msrb.mxu0 %v573_v25 }
 0x104   :  { %872 = vmatpush.msrb.mxu2 %v629_v36 }
 0x105   :  { %416 = vmatmul.f32.gmra.mxu1 %v390_v38  ;;  %644 = vmatpush.msrb.mxu0 %v572_v30 }
 0x106   :  { %873 = vmatpush.msrb.mxu2 %v628_v13 }
 0x107   :  { %645 = vmatpush.msrb.mxu0 %v571_v32 }
 0x108   :  { %874 = vmatpush.msrb.mxu2 %v627_v15 }
 0x109   :  { %646 = vmatpush.msrb.mxu0 %v570_v33 }
 0x10a   :  { %875 = vmatpush.msrb.mxu2 %v626_v46 }
 0x10b   :  { %442 = vmatmul.f32.gmra.mxu2 %v1470_v18  ;;  %647 = vmatpush.msrb.mxu0 %v569_v57 }
 0x10c   :  { %876 = vmatpush.msrb.mxu2 %v625_v24 }
 0x10d   :  { %648 = vmatpush.msrb.mxu0 %v568_v41 }
 0x10e   :  { %877 = vmatpush.msrb.mxu2 %v624_v27 }
 0x10f   :  { %649 = vmatpush.msrb.mxu0 %v567_v44 }
 0x110   :  { %878 = vmatpush.msrb.mxu2 %v623_v22 }
 0x112   :  { %879 = vmatpush.msrb.mxu2 %v622_v29 }
 0x113   :  { %445 = vmatmul.f32.gmra.mxu2 %v1473_v19 }
 0x114   :  { %880 = vmatpush.msrb.mxu2 %v621_v34 }
 0x116   :  { %881 = vmatpush.msrb.mxu2 %v620_v39 }
 0x118   :  { %882 = vmatpush.msrb.mxu2 %v619_v42 }
 0x11a   :  { %883 = vmatpush.msrb.mxu2 %v618_v45 }
 0x169   :  { %v1586_v7 = vpop.f32.mrf.mxu1 }
 0x16a   :  { %465 = vmatmul.f32.vlgmr.msra.gmra.mxu3 %v1586_v7  ;;  %v554_v5 = vsub.f32 %v1586_v7, %v1464_v16 }
 0x172   :  { %v1589_v63 = vpop.f32.mrf.mxu1 }
 0x173   :  { %468 = vmatmul.f32.gmra.mxu3 %v1589_v63  ;;  %v555_v27 = vsub.f32 %v1589_v63, %v1467_v17 }
 0x17a   :  { %v1592_v0 = vpop.f32.mrf.mxu1 }
 0x17b   :  { %471 = vmatmul.f32.gmra.mxu3 %v1592_v0  ;;  %v556_v42 = vsub.f32 %v1592_v0, %v1470_v18 }
 0x17e   :  { %v437_v28 = vpop.f32.mrf.mxu2 }
 0x182   :  { %v1595_v3 = vpop.f32.mrf.mxu1 }
 0x183   :  { %474 = vmatmul.f32.gmra.mxu3 %v1595_v3 }
 0x186   :  { %v440_v43 = vpop.f32.mrf.mxu2 }
 0x18e   :  { %v443_v31 = vpop.f32.mrf.mxu2 }
 0x196   :  { %v446_v38 = vpop.f32.mrf.mxu2 }
 0x1ed   :  { %v466_v35 = vpop.f32.mrf.mxu3 }
 0x1ee   :  { %v467_v37 = vadd.f32 %v466_v35, %v437_v28 }
 0x1f0   :  { %v1089_v40 = vmul.f32 -1.442695, %v467_v37 }
 0x1f2   :  { %1166 = vpow2.f32 %v1089_v40 }
 0x1f6   :  { %v469_v47 = vpop.f32.mrf.mxu3 }
 0x1f7   :  { %v470_v26 = vadd.f32 %v469_v47, %v440_v43 }
 0x1f8   :  { %v1167_v49 = vpop.eup %1166 }
 0x1f9   :  { %v490_v50 = vadd.f32 1.0, %v1167_v49  ;;  %v1090_v51 = vmul.f32 -1.442695, %v470_v26 }
 0x1fb   :  { %1168 = vrcp.f32 %v490_v50  ;;  %v505_v59 = vand.u32 2147483648, %v490_v50  ;;  %v503_v61 = vand.u32 2147483647, %v490_v50  ;;  %vm499_vm1 = vweird.f32 %v490_v50 }
 0x1fc   :  { %1170 = vpow2.f32 %v1090_v51 }
 0x1fd   :  { %v506_v4 = vor.u32 1.1754944e-38, %v505_v59  ;;  %vm504_vm3 = vcmp.eq.f32.partialorder %v503_v61, 8.507059e+37  ;;  %v595_v59 = vld [vmem:[#allocation7 + $0xd8] sm:$0xff]  ;;  %v593_v61 = vld [vmem:[#allocation7 + $0xc8] sm:$0xff] }
 0x1fe   :  { %v472_v54 = vpop.f32.mrf.mxu3 }
 0x1ff   :  { %v473_v48 = vadd.f32 %v472_v54, %v443_v31  ;;  %v557_v31 = vsub.f32 %v1595_v3, %v1473_v19 }
 0x201   :  { %v1169_v53 = vpop.eup %1168  ;;  %v1091_v58 = vmul.f32 -1.442695, %v473_v48 }
 0x202   :  { %v1171_v52 = vpop.eup %1170  ;;  %v495_v55 = vmul.f32 %v1169_v53, %v490_v50  ;;  %vm500_vm0 = vweird.f32 %v1169_v53 }
 0x203   :  { %v491_v56 = vadd.f32 1.0, %v1171_v52  ;;  %vm501_vm2 = vmor %vm499_vm1, %vm500_vm0 }
 0x204   :  { %v496_v14 = vsub.f32 1.0, %v495_v55  ;;  %v598_v55 = vld [vmem:[#allocation7 + $0xf0] sm:$0xff] }
 0x205   :  { %1172 = vrcp.f32 %v491_v56  ;;  %v520_v21 = vand.u32 2147483648, %v491_v56  ;;  %v518_v7 = vand.u32 2147483647, %v491_v56  ;;  %vm514_vm5 = vweird.f32 %v491_v56 }
 0x206   :  { %v497_v60 = vmul.f32 %v1169_v53, %v496_v14  ;;  %1174 = vpow2.f32 %v1091_v58  ;;  %v475_v62 = vpop.f32.mrf.mxu3  ;;  %v596_v58 = vld [vmem:[#allocation7 + $0xe0] sm:$0xff] }
 0x207   :  { %v476_v2 = vadd.f32 %v475_v62, %v446_v38  ;;  %v521_v25 = vor.u32 1.1754944e-38, %v520_v21  ;;  %vm519_vm7 = vcmp.eq.f32.partialorder %v518_v7, 8.507059e+37  ;;  %v589_v21 = vld [vmem:[#allocation7 + $0xa8] sm:$0xff] }
 0x208   :  { %v498_v1 = vadd.f32 %v1169_v53, %v497_v60  ;;  %v594_v60 = vld [vmem:[#allocation7 + $0xd0] sm:$0xff] }
 0x209   :  { %v1092_v9 = vmul.f32 -1.442695, %v476_v2  ;;  %v592_v2 = vld [vmem:[#allocation7 + $0xc0] sm:$0xff] }
 0x20a   :  { %v502_v6 = vsel %vm501_vm2, %v1169_v53, %v498_v1 }
 0x20b   :  { %v1173_v8 = vpop.eup %1172  ;;  %v507_v10 = vsel %vm504_vm3, %v506_v4, %v502_v6  ;;  %1176 = vpow2.f32 %v1092_v9  ;;  %v591_v6 = vld [vmem:[#allocation7 + $0xb8] sm:$0xff] }
 0x20c   :  { %v1175_v11 = vpop.eup %1174  ;;  %v510_v36 = vmul.f32 %v1173_v8, %v491_v56  ;;  %v558_v12 = vmul.f32 %v554_v5, %v507_v10  ;;  %vm515_vm4 = vweird.f32 %v1173_v8  ;;  %v597_v56 = vld [vmem:[#allocation7 + $0xe8] sm:$0xff] }
 0x20d   :  { %v492_v13 = vadd.f32 1.0, %v1175_v11  ;;  %vm516_vm6 = vmor %vm514_vm5, %vm515_vm4 }
 0x20e   :  { %v511_v20 = vsub.f32 1.0, %v510_v36  ;;  %v1601_v15 = vadd.f32 %v558_v12, %v1464_v16  ;;  %v590_v36 = vld [vmem:[#allocation7 + $0xb0] sm:$0xff] }
 0x20f   :  { %1178 = vrcp.f32 %v492_v13  ;;  %v535_v35 = vand.u32 2147483648, %v492_v13  ;;  %v533_v63 = vand.u32 2147483647, %v492_v13  ;;  %vm529_vm9 = vweird.f32 %v492_v13 }
 0x210   :  { %v512_v46 = vmul.f32 %v1173_v8, %v511_v20  ;;  %650 = vmatmul.f32.vlgmr.msrb.gmra.mxu0 %v1601_v15  ;;  %884 = vmatmul.f32.vlgmr.msrb.gmra.mxu2 %v1601_v15 }
 0x211   :  { %v1177_v24 = vpop.eup %1176  ;;  %v536_v41 = vor.u32 1.1754944e-38, %v535_v35  ;;  %vm534_vm11 = vcmp.eq.f32.partialorder %v533_v63, 8.507059e+37 }
 0x212   :  { %v513_v23 = vadd.f32 %v1173_v8, %v512_v46  ;;  %v493_v28 = vadd.f32 1.0, %v1177_v24 }
 0x214   :  { %v517_v16 = vsel %vm516_vm6, %v1173_v8, %v513_v23  ;;  %1180 = vrcp.f32 %v493_v28  ;;  %v550_v47 = vand.u32 2147483648, %v493_v28  ;;  %v548_v49 = vand.u32 2147483647, %v493_v28  ;;  %v588_v23 = vld [vmem:[#allocation7 + $0xa0] sm:$0xff] }
 0x215   :  { %v1179_v30 = vpop.eup %1178  ;;  %v522_v22 = vsel %vm519_vm7, %v521_v25, %v517_v16  ;;  %vm544_vm13 = vweird.f32 %v493_v28 }
 0x216   :  { %v525_v32 = vmul.f32 %v1179_v30, %v492_v13  ;;  %v559_v29 = vmul.f32 %v555_v27, %v522_v22  ;;  %vm530_vm8 = vweird.f32 %v1179_v30  ;;  %v551_v0 = vor.u32 1.1754944e-38, %v550_v47 }
 0x217   :  { %vm531_vm10 = vmor %vm529_vm9, %vm530_vm8  ;;  %vm549_vm15 = vcmp.eq.f32.partialorder %v548_v49, 8.507059e+37 }
 0x218   :  { %v526_v33 = vsub.f32 1.0, %v525_v32  ;;  %v1608_v34 = vadd.f32 %v559_v29, %v1467_v17  ;;  %v586_v32 = vld [vmem:[#allocation7 + $0x90] sm:$0xff] }
 0x21a   :  { %v527_v37 = vmul.f32 %v1179_v30, %v526_v33  ;;  %653 = vmatmul.f32.gmra.mxu0 %v1608_v34  ;;  %887 = vmatmul.f32.gmra.mxu2 %v1608_v34  ;;  %v1181_v57 = vpop.eup %1180 }
 0x21b   :  { %v540_v40 = vmul.f32 %v1181_v57, %v493_v28  ;;  %vm545_vm12 = vweird.f32 %v1181_v57  ;;  %v587_v28 = vld [vmem:[#allocation7 + $0x98] sm:$0xff] }
 0x21c   :  { %v528_v39 = vadd.f32 %v1179_v30, %v527_v37  ;;  %vm546_vm14 = vmor %vm544_vm13, %vm545_vm12 }
 0x21d   :  { %v541_v17 = vsub.f32 1.0, %v540_v40 }
 0x21e   :  { %v532_v43 = vsel %vm531_vm10, %v1179_v30, %v528_v39 }
 0x21f   :  { %v537_v44 = vsel %vm534_vm11, %v536_v41, %v532_v43  ;;  %v542_v26 = vmul.f32 %v1181_v57, %v541_v17 }
 0x220   :  { %v560_v45 = vmul.f32 %v556_v42, %v537_v44  ;;  %v584_v42 = vld [vmem:[#allocation7 + $0x80] sm:$0xff] }
 0x221   :  { %v543_v51 = vadd.f32 %v1181_v57, %v542_v26 }
 0x222   :  { %v1615_v50 = vadd.f32 %v560_v45, %v1470_v18  ;;  %v599_v18 = vld [vmem:[#allocation7 + $0xf8] sm:$0xff] }
 0x223   :  { %v547_v54 = vsel %vm546_vm14, %v1181_v57, %v543_v51  ;;  %839 = vmatpush.msrb.mxu1 %v599_v18  ;;  %v585_v57 = vld [vmem:[#allocation7 + $0x88] sm:$0xff] }
 0x224   :  { %656 = vmatmul.f32.gmra.mxu0 %v1615_v50  ;;  %890 = vmatmul.f32.gmra.mxu2 %v1615_v50  ;;  %v552_v53 = vsel %vm549_vm15, %v551_v0, %v547_v54 }
 0x225   :  { %v561_v48 = vmul.f32 %v557_v31, %v552_v53  ;;  %840 = vmatpush.msrb.mxu1 %v598_v55 }
 0x227   :  { %v1622_v52 = vadd.f32 %v561_v48, %v1473_v19  ;;  %841 = vmatpush.msrb.mxu1 %v597_v56 }
 0x229   :  { %842 = vmatpush.msrb.mxu1 %v596_v58 }
 0x22b   :  { %843 = vmatpush.msrb.mxu1 %v595_v59 }
 0x22c   :  { %659 = vmatmul.f32.gmra.mxu0 %v1622_v52  ;;  %893 = vmatmul.f32.gmra.mxu2 %v1622_v52 }
 0x22d   :  { %844 = vmatpush.msrb.mxu1 %v594_v60 }
 0x22f   :  { %845 = vmatpush.msrb.mxu1 %v593_v61 }
 0x231   :  { %846 = vmatpush.msrb.mxu1 %v592_v2 }
 0x233   :  { %847 = vmatpush.msrb.mxu1 %v591_v6 }
 0x235   :  { %848 = vmatpush.msrb.mxu1 %v590_v36 }
 0x237   :  { %849 = vmatpush.msrb.mxu1 %v589_v21 }
 0x239   :  { %850 = vmatpush.msrb.mxu1 %v588_v23 }
 0x23b   :  { %851 = vmatpush.msrb.mxu1 %v587_v28 }
 0x23d   :  { %852 = vmatpush.msrb.mxu1 %v586_v32 }
 0x23f   :  { %853 = vmatpush.msrb.mxu1 %v585_v57 }
 0x241   :  { %854 = vmatpush.msrb.mxu1 %v584_v42 }
 0x28d   :  { %v1626_v14 = vpop.f32.mrf.mxu0 }
 0x28e   :  { %v1629_v3 = vmul.f32 0.70710677, %v1626_v14 }
 0x290   :  { %v671_v19 = vmul.f32 %v1629_v3, %v1629_v3 }
 0x292   :  { %v1633_v38 = vmin.f32 %v671_v19, 16.0 }
 0x294   :  { %v673_v62 = vmul.f32 2.1237322e-06, %v1633_v38  ;;  %v684_v1 = vmul.f32 3.8918573e-05, %v1633_v38 }
 0x296   :  { %v674_v4 = vadd.f32 0.00028619796, %v673_v62  ;;  %v685_v5 = vadd.f32 0.001143296, %v684_v1 }
 0x297   :  { %v1637_v8 = vpop.f32.mrf.mxu0 }
 0x298   :  { %v675_v9 = vmul.f32 %v674_v4, %v1633_v38  ;;  %v686_v10 = vmul.f32 %v685_v5, %v1633_v38  ;;  %v1642_v11 = vmul.f32 0.70710677, %v1637_v8 }
 0x29a   :  { %v676_v12 = vadd.f32 0.0036580483, %v675_v9  ;;  %v687_v13 = vadd.f32 0.014752088, %v686_v10  ;;  %v711_v20 = vmul.f32 %v1642_v11, %v1642_v11 }
 0x29c   :  { %v688_v46 = vmul.f32 %v687_v13, %v1633_v38  ;;  %v1647_v7 = vmin.f32 %v711_v20, 16.0  ;;  %v677_v24 = vmul.f32 %v676_v12, %v1633_v38 }
 0x29e   :  { %v689_v25 = vadd.f32 0.112945676, %v688_v46  ;;  %v713_v27 = vmul.f32 2.1237322e-06, %v1647_v7  ;;  %v724_v16 = vmul.f32 3.8918573e-05, %v1647_v7 }
 0x29f   :  { %v678_v29 = vadd.f32 0.05243302, %v677_v24 }
 0x2a0   :  { %v690_v30 = vmul.f32 %v689_v25, %v1633_v38  ;;  %v714_v22 = vadd.f32 0.00028619796, %v713_v27  ;;  %v725_v35 = vadd.f32 0.001143296, %v724_v16 }
 0x2a1   :  { %v1653_v33 = vpop.f32.mrf.mxu0  ;;  %v679_v43 = vmul.f32 %v678_v29, %v1633_v38 }
 0x2a2   :  { %v691_v37 = vadd.f32 0.4994258, %v690_v30  ;;  %v715_v63 = vmul.f32 %v714_v22, %v1647_v7  ;;  %v1657_v39 = vmul.f32 0.70710677, %v1653_v33  ;;  %v726_v40 = vmul.f32 %v725_v35, %v1647_v7 }
 0x2a3   :  { %v680_v51 = vadd.f32 0.18741608, %v679_v43 }
 0x2a4   :  { %v692_v41 = vmul.f32 %v691_v37, %v1633_v38  ;;  %v751_v17 = vmul.f32 %v1657_v39, %v1657_v39  ;;  %v727_v44 = vadd.f32 0.014752088, %v726_v40  ;;  %v716_v47 = vadd.f32 0.0036580483, %v715_v63 }
 0x2a5   :  { %v681_v59 = vmul.f32 %v680_v51, %v1633_v38 }
 0x2a6   :  { %v693_v45 = vadd.f32 1.0, %v692_v41  ;;  %v1664_v26 = vmin.f32 %v751_v17, 16.0  ;;  %v728_v49 = vmul.f32 %v727_v44, %v1647_v7  ;;  %v717_v54 = vmul.f32 %v716_v47, %v1647_v7 }
 0x2a7   :  { %v682_v36 = vadd.f32 1.1283791, %v681_v59 }
 0x2a8   :  { %1182 = vrcp.f32 %v693_v45  ;;  %v753_v0 = vmul.f32 2.1237322e-06, %v1664_v26  ;;  %v729_v48 = vadd.f32 0.112945676, %v728_v49  ;;  %v764_v55 = vmul.f32 3.8918573e-05, %v1664_v26 }
 0x2a9   :  { %v1668_v31 = vpop.f32.mrf.mxu0  ;;  %v718_v61 = vadd.f32 0.05243302, %v717_v54  ;;  %v705_v38 = vand.u32 2147483648, %v693_v45  ;;  %v703_v24 = vand.u32 2147483647, %v693_v45  ;;  %vm699_vm1 = vweird.f32 %v693_v45 }
 0x2aa   :  { %v1672_v53 = vmul.f32 0.70710677, %v1668_v31  ;;  %v754_v18 = vadd.f32 0.00028619796, %v753_v0  ;;  %v730_v58 = vmul.f32 %v729_v48, %v1647_v7  ;;  %v765_v19 = vadd.f32 0.001143296, %v764_v55 }
 0x2ab   :  { %v719_v13 = vmul.f32 %v718_v61, %v1647_v7  ;;  %v706_v22 = vor.u32 1.1754944e-38, %v705_v38  ;;  %v683_v35 = vmul.f32 %v682_v36, %v1629_v3  ;;  %vm704_vm3 = vcmp.eq.f32.partialorder %v703_v24, 8.507059e+37  ;;  %v616_v38 = vld [vmem:[#allocation8 + $0xf8] sm:$0xff] }
 0x2ac   :  { %v791_v56 = vmul.f32 %v1672_v53, %v1672_v53  ;;  %v731_v1 = vadd.f32 0.4994258, %v730_v58  ;;  %v755_v4 = vmul.f32 %v754_v18, %v1664_v26  ;;  %v766_v9 = vmul.f32 %v765_v19, %v1664_v26  ;;  %897 = vmatpush.msrb.mxu3 %v616_v38 }
 0x2ad   :  { %v720_v32 = vadd.f32 0.18741608, %v719_v13  ;;  %v663_v48 = vmul.f32 0.5, %v1626_v14  ;;  %v615_v13 = vld [vmem:[#allocation8 + $0xf0] sm:$0xff] }
 0x2ae   :  { %v1183_v60 = vpop.eup %1182  ;;  %v1679_v62 = vmin.f32 %v791_v56, 16.0  ;;  %v732_v6 = vmul.f32 %v731_v1, %v1647_v7  ;;  %v767_v46 = vadd.f32 0.014752088, %v766_v9  ;;  %v756_v27 = vadd.f32 0.0036580483, %v755_v4  ;;  %898 = vmatpush.msrb.mxu3 %v615_v13  ;;  %v602_v13 = vld [vmem:[#allocation8 + $0x88] sm:$0xff] }
 0x2af   :  { %v695_v2 = vmul.f32 %v1183_v60, %v693_v45  ;;  %vm700_vm0 = vweird.f32 %v1183_v60  ;;  %v721_v45 = vmul.f32 %v720_v32, %v1647_v7 }
 0x2b0   :  { %v793_v5 = vmul.f32 2.1237322e-06, %v1679_v62  ;;  %v804_v10 = vmul.f32 3.8918573e-05, %v1679_v62  ;;  %v733_v21 = vadd.f32 1.0, %v732_v6  ;;  %v768_v30 = vmul.f32 %v767_v46, %v1664_v26  ;;  %vm701_vm2 = vmor %vm699_vm1, %vm700_vm0 }
 0x2b1   :  { %v696_v12 = vsub.f32 1.0, %v695_v2  ;;  %v757_v40 = vmul.f32 %v756_v27, %v1664_v26  ;;  %v722_v58 = vadd.f32 1.1283791, %v721_v45  ;;  %v614_v27 = vld [vmem:[#allocation8 + $0xe8] sm:$0xff] }
 0x2b2   :  { %v794_v20 = vadd.f32 0.00028619796, %v793_v5  ;;  %v805_v25 = vadd.f32 0.001143296, %v804_v10  ;;  %1184 = vrcp.f32 %v733_v21  ;;  %v769_v63 = vadd.f32 0.112945676, %v768_v30  ;;  %899 = vmatpush.msrb.mxu3 %v614_v27 }
 0x2b3   :  { %v697_v23 = vmul.f32 %v1183_v60, %v696_v12  ;;  %v758_v0 = vadd.f32 0.05243302, %v757_v40  ;;  %v745_v59 = vand.u32 2147483648, %v733_v21  ;;  %v743_v1 = vand.u32 2147483647, %v733_v21  ;;  %v1028_v27 = vld [vmem:[#allocation11 + $0x70] sm:$0xff] }
 0x2b4   :  { %v795_v16 = vmul.f32 %v794_v20, %v1679_v62  ;;  %v806_v29 = vmul.f32 %v805_v25, %v1679_v62  ;;  %v770_v17 = vmul.f32 %v769_v63, %v1664_v26  ;;  %vm739_vm5 = vweird.f32 %v733_v21 }
 0x2b5   :  { %v698_v28 = vadd.f32 %v1183_v60, %v697_v23  ;;  %v759_v2 = vmul.f32 %v758_v0, %v1664_v26  ;;  %v746_v9 = vor.u32 1.1754944e-38, %v745_v59  ;;  %v723_v10 = vmul.f32 %v722_v58, %v1642_v11  ;;  %v607_v59 = vld [vmem:[#allocation8 + $0xb0] sm:$0xff] }
 0x2b6   :  { %v807_v41 = vadd.f32 0.014752088, %v806_v29  ;;  %v796_v43 = vadd.f32 0.0036580483, %v795_v16  ;;  %v771_v3 = vadd.f32 0.4994258, %v770_v17 }
 0x2b7   :  { %v702_v37 = vsel %vm701_vm2, %v1183_v60, %v698_v28  ;;  %vm744_vm7 = vcmp.eq.f32.partialorder %v743_v1, 8.507059e+37  ;;  %v760_v20 = vadd.f32 0.18741608, %v759_v2  ;;  %v613_v28 = vld [vmem:[#allocation8 + $0xe0] sm:$0xff]  ;;  %v664_v30 = vmul.f32 0.5, %v1637_v8 }
 0x2b8   :  { %v707_v57 = vsel %vm704_vm3, %v706_v22, %v702_v37  ;;  %v1185_v44 = vpop.eup %1184  ;;  %v808_v47 = vmul.f32 %v807_v41, %v1679_v62  ;;  %v797_v55 = vmul.f32 %v796_v43, %v1679_v62  ;;  %v772_v19 = vmul.f32 %v771_v3, %v1664_v26  ;;  %900 = vmatpush.msrb.mxu3 %v613_v28  ;;  %v1026_v28 = vld [vmem:[#allocation11 + $0x60] sm:$0xff] }
 0x2b9   :  { %v708_v42 = vmul.f32 %v707_v57, %v683_v35  ;;  %v735_v51 = vmul.f32 %v1185_v44, %v733_v21  ;;  %vm740_vm4 = vweird.f32 %v1185_v44  ;;  %v761_v11 = vmul.f32 %v760_v20, %v1664_v26  ;;  %v612_v35 = vld [vmem:[#allocation8 + $0xd8] sm:$0xff]  ;;  %v611_v57 = vld [vmem:[#allocation8 + $0xd0] sm:$0xff] }
 0x2ba   :  { %v809_v54 = vadd.f32 0.112945676, %v808_v47  ;;  %v773_v4 = vadd.f32 1.0, %v772_v19  ;;  %v798_v6 = vadd.f32 0.05243302, %v797_v55  ;;  %vm741_vm6 = vmor %vm739_vm5, %vm740_vm4  ;;  %901 = vmatpush.msrb.mxu3 %v612_v35  ;;  %v609_v47 = vld [vmem:[#allocation8 + $0xc0] sm:$0xff] }
 0x2bb   :  { %v1093_v49 = vclamps-f32 %v708_v42, 1.0  ;;  %v736_v56 = vsub.f32 1.0, %v735_v51  ;;  %v762_v40 = vadd.f32 1.1283791, %v761_v11  ;;  %v665_v2 = vmul.f32 0.5, %v1653_v33  ;;  %v1024_v11 = vld [vmem:[#allocation11 + $0x50] sm:$0xff] }
 0x2bc   :  { %v810_v60 = vmul.f32 %v809_v54, %v1679_v62  ;;  %1186 = vrcp.f32 %v773_v4  ;;  %v799_v23 = vmul.f32 %v798_v6, %v1679_v62  ;;  %v785_v41 = vand.u32 2147483648, %v773_v4  ;;  %902 = vmatpush.msrb.mxu3 %v611_v57  ;;  %v605_v6 = vld [vmem:[#allocation8 + $0xa0] sm:$0xff]  ;;  %v1019_v57 = vld [vmem:[#allocation11 + $0x28] sm:$0xff] }
 0x2bd   :  { %v831_v18 = vadd.f32 1.0, %v1093_v49  ;;  %v737_v61 = vmul.f32 %v1185_v44, %v736_v56  ;;  %v783_v26 = vand.u32 2147483647, %v773_v4  ;;  %vm779_vm9 = vweird.f32 %v773_v4 }
 0x2be   :  { %v811_v5 = vadd.f32 0.4994258, %v810_v60  ;;  %v800_v22 = vadd.f32 0.18741608, %v799_v23  ;;  %v763_v49 = vmul.f32 %v762_v40, %v1657_v39  ;;  %v786_v51 = vor.u32 1.1754944e-38, %v785_v41  ;;  %v1018_v41 = vld [vmem:[#allocation11 + $0x20] sm:$0xff] }
 0x2bf   :  { %v835_v7 = vmul.f32 %v831_v18, %v663_v48  ;;  %v738_v14 = vadd.f32 %v1185_v44, %v737_v61  ;;  %vm784_vm11 = vcmp.eq.f32.partialorder %v783_v26, 8.507059e+37  ;;  %v608_v48 = vld [vmem:[#allocation8 + $0xb8] sm:$0xff] }
 0x2c0   :  { %v812_v12 = vmul.f32 %v811_v5, %v1679_v62  ;;  %v801_v43 = vmul.f32 %v800_v22, %v1679_v62  ;;  %v1022_v22 = vld [vmem:[#allocation11 + $0x40] sm:$0xff] }
 0x2c1   :  { %855 = vmatmul.f32.vlgmr.msrb.gmra.mxu1 %v835_v7  ;;  %v742_v36 = vsel %vm741_vm6, %v1185_v44, %v738_v14  ;;  %v610_v44 = vld [vmem:[#allocation8 + $0xc8] sm:$0xff] }
 0x2c2   :  { %v747_v46 = vsel %vm744_vm7, %v746_v9, %v742_v36  ;;  %v813_v25 = vadd.f32 1.0, %v812_v12  ;;  %v1187_v16 = vpop.eup %1186  ;;  %903 = vmatpush.msrb.mxu3 %v610_v44  ;;  %v802_v3 = vadd.f32 1.1283791, %v801_v43  ;;  %v606_v7 = vld [vmem:[#allocation8 + $0xa8] sm:$0xff]  ;;  %v603_v12 = vld [vmem:[#allocation8 + $0x90] sm:$0xff] }
 0x2c3   :  { %v748_v24 = vmul.f32 %v747_v46, %v723_v10  ;;  %v775_v29 = vmul.f32 %v1187_v16, %v773_v4  ;;  %vm780_vm8 = vweird.f32 %v1187_v16  ;;  %v604_v10 = vld [vmem:[#allocation8 + $0x98] sm:$0xff]  ;;  %v601_v46 = vld [vmem:[#allocation8 + $0x80] sm:$0xff]  ;;  %v1016_v43 = vld [vmem:[#allocation11 + $0x10] sm:$0xff] }
 0x2c4   :  { %1188 = vrcp.f32 %v813_v25  ;;  %vm781_vm10 = vmor %vm779_vm9, %vm780_vm8  ;;  %v825_v62 = vand.u32 2147483648, %v813_v25  ;;  %v823_v56 = vand.u32 2147483647, %v813_v25  ;;  %904 = vmatpush.msrb.mxu3 %v609_v47  ;;  %vm819_vm13 = vweird.f32 %v813_v25  ;;  %v1014_v47 = vld [vmem:[#allocation11] sm:$0xff] }
 0x2c5   :  { %v1094_v21 = vclamps-f32 %v748_v24, 1.0  ;;  %v776_v63 = vsub.f32 1.0, %v775_v29  ;;  %v803_v61 = vmul.f32 %v802_v3, %v1672_v53  ;;  %v666_v53 = vmul.f32 0.5, %v1668_v31  ;;  %v885_v29 = vpop.f32.mrf.mxu2 }
 0x2c6   :  { %905 = vmatpush.msrb.mxu3 %v608_v48  ;;  %v826_v60 = vor.u32 1.1754944e-38, %v825_v62  ;;  %vm824_vm15 = vcmp.eq.f32.partialorder %v823_v56, 8.507059e+37 }
 0x2c7   :  { %v832_v32 = vadd.f32 1.0, %v1094_v21  ;;  %v777_v17 = vmul.f32 %v1187_v16, %v776_v63  ;;  %v1027_v21 = vld [vmem:[#allocation11 + $0x68] sm:$0xff] }
 0x2c8   :  { %906 = vmatpush.msrb.mxu3 %v607_v59 }
 0x2c9   :  { %v836_v37 = vmul.f32 %v832_v32, %v664_v30  ;;  %v778_v45 = vadd.f32 %v1187_v16, %v777_v17  ;;  %v1023_v30 = vld [vmem:[#allocation11 + $0x48] sm:$0xff]  ;;  %v1021_v32 = vld [vmem:[#allocation11 + $0x38] sm:$0xff] }
 0x2ca   :  { %v1189_v42 = vpop.eup %1188  ;;  %907 = vmatpush.msrb.mxu3 %v606_v7  ;;  %v1015_v17 = vld [vmem:[#allocation11 + $0x8] sm:$0xff] }
 0x2cb   :  { %858 = vmatmul.f32.gmra.mxu1 %v836_v37  ;;  %v815_v8 = vmul.f32 %v1189_v42, %v813_v25  ;;  %v782_v54 = vsel %vm781_vm10, %v1187_v16, %v778_v45  ;;  %vm820_vm12 = vweird.f32 %v1189_v42  ;;  %v1029_v25 = vld [vmem:[#allocation11 + $0x78] sm:$0xff]  ;;  %v1020_v37 = vld [vmem:[#allocation11 + $0x30] sm:$0xff] }
 0x2cc   :  { %v787_v18 = vsel %vm784_vm11, %v786_v51, %v782_v54  ;;  %vm821_vm14 = vmor %vm819_vm13, %vm820_vm12  ;;  %908 = vmatpush.msrb.mxu3 %v605_v6  ;;  %1030 = vmatpush.msra.mxu0 %v1029_v25  ;;  %v1025_v16 = vld [vmem:[#allocation11 + $0x58] sm:$0xff] }
 0x2cd   :  { %v816_v0 = vsub.f32 1.0, %v815_v8  ;;  %v788_v58 = vmul.f32 %v787_v18, %v763_v49  ;;  %1101 = vmatpush.msra.mxu1 %v1029_v25  ;;  %1102 = vmatpush.msra.mxu2 %v1029_v25  ;;  %v888_v44 = vpop.f32.mrf.mxu2 }
 0x2ce   :  { %909 = vmatpush.msrb.mxu3 %v604_v10  ;;  %1031 = vmatpush.msra.mxu0 %v1028_v27 }
 0x2cf   :  { %v817_v55 = vmul.f32 %v1189_v42, %v816_v0  ;;  %v1095_v39 = vclamps-f32 %v788_v58, 1.0  ;;  %1104 = vmatpush.msra.mxu1 %v1028_v27  ;;  %1105 = vmatpush.msra.mxu2 %v1028_v27 }
 0x2d0   :  { %910 = vmatpush.msrb.mxu3 %v603_v12  ;;  %1032 = vmatpush.msra.mxu0 %v1027_v21 }
 0x2d1   :  { %v818_v19 = vadd.f32 %v1189_v42, %v817_v55  ;;  %v833_v4 = vadd.f32 1.0, %v1095_v39  ;;  %1107 = vmatpush.msra.mxu1 %v1027_v21  ;;  %1108 = vmatpush.msra.mxu2 %v1027_v21 }
 0x2d2   :  { %911 = vmatpush.msrb.mxu3 %v602_v13  ;;  %1033 = vmatpush.msra.mxu0 %v1026_v28 }
 0x2d3   :  { %v822_v1 = vsel %vm821_vm14, %v1189_v42, %v818_v19  ;;  %v837_v9 = vmul.f32 %v833_v4, %v665_v2  ;;  %1110 = vmatpush.msra.mxu1 %v1026_v28  ;;  %1111 = vmatpush.msra.mxu2 %v1026_v28  ;;  %v1017_v42 = vld [vmem:[#allocation11 + $0x18] sm:$0xff] }
 0x2d4   :  { %v827_v5 = vsel %vm824_vm15, %v826_v60, %v822_v1  ;;  %912 = vmatpush.msrb.mxu3 %v601_v46  ;;  %1034 = vmatpush.msra.mxu0 %v1025_v16 }
 0x2d5   :  { %v828_v14 = vmul.f32 %v827_v5, %v803_v61  ;;  %861 = vmatmul.f32.gmra.mxu1 %v837_v9  ;;  %1114 = vmatpush.msra.mxu2 %v1025_v16  ;;  %v891_v48 = vpop.f32.mrf.mxu2 }
 0x2d6   :  { %1103 = vmatpush.msra.mxu3 %v1029_v25  ;;  %1113 = vmatpush.msra.mxu1 %v1025_v16 }
 0x2d7   :  { %v1096_v36 = vclamps-f32 %v828_v14, 1.0  ;;  %1035 = vmatpush.msra.mxu0 %v1024_v11  ;;  %1117 = vmatpush.msra.mxu2 %v1024_v11 }
 0x2d8   :  { %1106 = vmatpush.msra.mxu3 %v1028_v27  ;;  %1116 = vmatpush.msra.mxu1 %v1024_v11 }
 0x2d9   :  { %v834_v38 = vadd.f32 1.0, %v1096_v36  ;;  %1036 = vmatpush.msra.mxu0 %v1023_v30  ;;  %1120 = vmatpush.msra.mxu2 %v1023_v30 }
 0x2da   :  { %1109 = vmatpush.msra.mxu3 %v1027_v21  ;;  %1119 = vmatpush.msra.mxu1 %v1023_v30 }
 0x2db   :  { %v838_v20 = vmul.f32 %v834_v38, %v666_v53  ;;  %1037 = vmatpush.msra.mxu0 %v1022_v22  ;;  %1123 = vmatpush.msra.mxu2 %v1022_v22 }
 0x2dc   :  { %1112 = vmatpush.msra.mxu3 %v1026_v28  ;;  %1122 = vmatpush.msra.mxu1 %v1022_v22 }
 0x2dd   :  { %864 = vmatmul.f32.gmra.mxu1 %v838_v20  ;;  %1038 = vmatpush.msra.mxu0 %v1021_v32  ;;  %v894_v9 = vpop.f32.mrf.mxu2 }
 0x2de   :  { %1115 = vmatpush.msra.mxu3 %v1025_v16  ;;  %1125 = vmatpush.msra.mxu1 %v1021_v32 }
 0x2df   :  { %1126 = vmatpush.msra.mxu2 %v1021_v32  ;;  %1039 = vmatpush.msra.mxu0 %v1020_v37 }
 0x2e0   :  { %1118 = vmatpush.msra.mxu3 %v1024_v11  ;;  %1128 = vmatpush.msra.mxu1 %v1020_v37 }
 0x2e1   :  { %1129 = vmatpush.msra.mxu2 %v1020_v37  ;;  %1040 = vmatpush.msra.mxu0 %v1019_v57 }
 0x2e2   :  { %1121 = vmatpush.msra.mxu3 %v1023_v30  ;;  %1131 = vmatpush.msra.mxu1 %v1019_v57 }
 0x2e3   :  { %1132 = vmatpush.msra.mxu2 %v1019_v57  ;;  %1041 = vmatpush.msra.mxu0 %v1018_v41 }
 0x2e4   :  { %1124 = vmatpush.msra.mxu3 %v1022_v22  ;;  %1134 = vmatpush.msra.mxu1 %v1018_v41 }
 0x2e5   :  { %1135 = vmatpush.msra.mxu2 %v1018_v41  ;;  %1042 = vmatpush.msra.mxu0 %v1017_v42 }
 0x2e6   :  { %1127 = vmatpush.msra.mxu3 %v1021_v32  ;;  %1137 = vmatpush.msra.mxu1 %v1017_v42 }
 0x2e7   :  { %1138 = vmatpush.msra.mxu2 %v1017_v42  ;;  %1043 = vmatpush.msra.mxu0 %v1016_v43 }
 0x2e8   :  { %1130 = vmatpush.msra.mxu3 %v1020_v37  ;;  %1140 = vmatpush.msra.mxu1 %v1016_v43 }
 0x2e9   :  { %1141 = vmatpush.msra.mxu2 %v1016_v43  ;;  %1044 = vmatpush.msra.mxu0 %v1015_v17 }
 0x2ea   :  { %1133 = vmatpush.msra.mxu3 %v1019_v57  ;;  %1143 = vmatpush.msra.mxu1 %v1015_v17 }
 0x2eb   :  { %1144 = vmatpush.msra.mxu2 %v1015_v17  ;;  %1045 = vmatpush.msra.mxu0 %v1014_v47 }
 0x2ec   :  { %1136 = vmatpush.msra.mxu3 %v1018_v41  ;;  %1146 = vmatpush.msra.mxu1 %v1014_v47 }
 0x2ed   :  { %1147 = vmatpush.msra.mxu2 %v1014_v47 }
 0x2ee   :  { %1139 = vmatpush.msra.mxu3 %v1017_v42 }
 0x2f0   :  { %1142 = vmatpush.msra.mxu3 %v1016_v43 }
 0x2f2   :  { %1145 = vmatpush.msra.mxu3 %v1015_v17 }
 0x2f4   :  { %1148 = vmatpush.msra.mxu3 %v1014_v47 }
 0x33e   :  { %v1710_v33 = vpop.f32.mrf.mxu1 }
 0x33f   :  { %913 = vmatmul.f32.vlgmr.msrb.gmra.mxu3 %v1710_v33  ;;  %v1002_v7 = vsub.f32 %v1710_v33, %v1601_v15 }
 0x348   :  { %v1713_v23 = vpop.f32.mrf.mxu1 }
 0x349   :  { %916 = vmatmul.f32.gmra.mxu3 %v1713_v23 }
 0x352   :  { %v1716_v24 = vpop.f32.mrf.mxu1 }
 0x353   :  { %919 = vmatmul.f32.gmra.mxu3 %v1716_v24  ;;  %v1004_v42 = vsub.f32 %v1716_v24, %v1615_v50 }
 0x35a   :  { %v1719_v31 = vpop.f32.mrf.mxu1 }
 0x35b   :  { %922 = vmatmul.f32.gmra.mxu3 %v1719_v31  ;;  %v1005_v24 = vsub.f32 %v1719_v31, %v1622_v52 }
 0x3c2   :  { %v914_v35 = vpop.f32.mrf.mxu3 }
 0x3c3   :  { %v915_v63 = vadd.f32 %v914_v35, %v885_v29 }
 0x3c5   :  { %v1097_v40 = vmul.f32 -1.442695, %v915_v63 }
 0x3c7   :  { %1190 = vpow2.f32 %v1097_v40 }
 0x3cc   :  { %v917_v45 = vpop.f32.mrf.mxu3 }
 0x3cd   :  { %v1191_v26 = vpop.eup %1190  ;;  %v918_v49 = vadd.f32 %v917_v45, %v888_v44 }
 0x3ce   :  { %v938_v8 = vadd.f32 1.0, %v1191_v26 }
 0x3cf   :  { %v1098_v51 = vmul.f32 -1.442695, %v918_v49 }
 0x3d0   :  { %1192 = vrcp.f32 %v938_v8  ;;  %v953_v55 = vand.u32 2147483648, %v938_v8  ;;  %v951_v58 = vand.u32 2147483647, %v938_v8  ;;  %vm947_vm1 = vweird.f32 %v938_v8 }
 0x3d1   :  { %1194 = vpow2.f32 %v1098_v51 }
 0x3d2   :  { %v954_v60 = vor.u32 1.1754944e-38, %v953_v55  ;;  %vm952_vm3 = vcmp.eq.f32.partialorder %v951_v58, 8.507059e+37 }
 0x3d6   :  { %v1193_v0 = vpop.eup %1192  ;;  %v920_v59 = vpop.f32.mrf.mxu3 }
 0x3d7   :  { %v943_v3 = vmul.f32 %v1193_v0, %v938_v8  ;;  %v1195_v54 = vpop.eup %1194  ;;  %vm948_vm0 = vweird.f32 %v1193_v0  ;;  %v921_v19 = vadd.f32 %v920_v59, %v891_v48 }
 0x3d8   :  { %v939_v18 = vadd.f32 1.0, %v1195_v54  ;;  %vm949_vm2 = vmor %vm947_vm1, %vm948_vm0 }
 0x3d9   :  { %v944_v62 = vsub.f32 1.0, %v943_v3  ;;  %v1099_v61 = vmul.f32 -1.442695, %v921_v19 }
 0x3da   :  { %1196 = vrcp.f32 %v939_v18  ;;  %v968_v38 = vand.u32 2147483648, %v939_v18  ;;  %v966_v46 = vand.u32 2147483647, %v939_v18  ;;  %vm962_vm5 = vweird.f32 %v939_v18 }
 0x3db   :  { %v945_v56 = vmul.f32 %v1193_v0, %v944_v62  ;;  %1198 = vpow2.f32 %v1099_v61 }
 0x3dc   :  { %v969_v27 = vor.u32 1.1754944e-38, %v968_v38  ;;  %vm967_vm7 = vcmp.eq.f32.partialorder %v966_v46, 8.507059e+37 }
 0x3dd   :  { %v946_v39 = vadd.f32 %v1193_v0, %v945_v56 }
 0x3de   :  { %v923_v10 = vpop.f32.mrf.mxu3 }
 0x3df   :  { %v950_v1 = vsel %vm949_vm2, %v1193_v0, %v946_v39  ;;  %v924_v12 = vadd.f32 %v923_v10, %v894_v9 }
 0x3e0   :  { %v955_v2 = vsel %vm952_vm3, %v954_v60, %v950_v1  ;;  %v1197_v5 = vpop.eup %1196 }
 0x3e1   :  { %v1006_v4 = vmul.f32 %v1002_v7, %v955_v2  ;;  %v958_v6 = vmul.f32 %v1197_v5, %v939_v18  ;;  %v1199_v53 = vpop.eup %1198  ;;  %v1100_v20 = vmul.f32 -1.442695, %v924_v12  ;;  %vm963_vm4 = vweird.f32 %v1197_v5 }
 0x3e2   :  { %v940_v33 = vadd.f32 1.0, %v1199_v53  ;;  %vm964_vm6 = vmor %vm962_vm5, %vm963_vm4 }
 0x3e3   :  { %v1010_v14 = vadd.f32 %v1006_v4, %v1601_v15  ;;  %v959_v36 = vsub.f32 1.0, %v958_v6  ;;  %1200 = vpow2.f32 %v1100_v20  ;;  %v1003_v15 = vsub.f32 %v1713_v23, %v1608_v34 }
 0x3e4   :  { %1202 = vrcp.f32 %v940_v33  ;;  %v983_v37 = vand.u32 2147483648, %v940_v33  ;;  %v981_v57 = vand.u32 2147483647, %v940_v33  ;;  %vm977_vm9 = vweird.f32 %v940_v33 }
 0x3e5   :  { %1046 = vmatmul.f32.vlgmr.msra.gmra.mxu0 %v1010_v14  ;;  %v960_v13 = vmul.f32 %v1197_v5, %v959_v36 }
 0x3e6   :  { %v984_v41 = vor.u32 1.1754944e-38, %v983_v37  ;;  %vm982_vm11 = vcmp.eq.f32.partialorder %v981_v57, 8.507059e+37 }
 0x3e7   :  { %v961_v25 = vadd.f32 %v1197_v5, %v960_v13 }
 0x3e9   :  { %v965_v21 = vsel %vm964_vm6, %v1197_v5, %v961_v25  ;;  %v1201_v11 = vpop.eup %1200 }
 0x3ea   :  { %v970_v28 = vsel %vm967_vm7, %v969_v27, %v965_v21  ;;  %v1203_v22 = vpop.eup %1202  ;;  %v941_v32 = vadd.f32 1.0, %v1201_v11 }
 0x3eb   :  { %v1007_v16 = vmul.f32 %v1003_v15, %v970_v28  ;;  %v973_v29 = vmul.f32 %v1203_v22, %v940_v33  ;;  %vm978_vm8 = vweird.f32 %v1203_v22 }
 0x3ec   :  { %1204 = vrcp.f32 %v941_v32  ;;  %vm979_vm10 = vmor %vm977_vm9, %vm978_vm8  ;;  %v998_v8 = vand.u32 2147483648, %v941_v32  ;;  %v996_v49 = vand.u32 2147483647, %v941_v32  ;;  %vm992_vm13 = vweird.f32 %v941_v32 }
 0x3ed   :  { %v1011_v30 = vadd.f32 %v1007_v16, %v1608_v34  ;;  %v974_v35 = vsub.f32 1.0, %v973_v29 }
 0x3ee   :  { %v999_v0 = vor.u32 1.1754944e-38, %v998_v8  ;;  %vm997_vm15 = vcmp.eq.f32.partialorder %v996_v49, 8.507059e+37 }
 0x3ef   :  { %1049 = vmatmul.f32.vlgmr.msra.gmra.mxu1 %v1011_v30  ;;  %v975_v63 = vmul.f32 %v1203_v22, %v974_v35 }
 0x3f1   :  { %v976_v40 = vadd.f32 %v1203_v22, %v975_v63 }
 0x3f2   :  { %v1205_v23 = vpop.eup %1204 }
 0x3f3   :  { %v988_v43 = vmul.f32 %v1205_v23, %v941_v32  ;;  %v980_v34 = vsel %vm979_vm10, %v1203_v22, %v976_v40  ;;  %vm993_vm12 = vweird.f32 %v1205_v23 }
 0x3f4   :  { %v985_v17 = vsel %vm982_vm11, %v984_v41, %v980_v34  ;;  %vm994_vm14 = vmor %vm992_vm13, %vm993_vm12 }
 0x3f5   :  { %v989_v26 = vsub.f32 1.0, %v988_v43  ;;  %v1008_v44 = vmul.f32 %v1004_v42, %v985_v17 }
 0x3f7   :  { %v990_v45 = vmul.f32 %v1205_v23, %v989_v26  ;;  %v1012_v47 = vadd.f32 %v1008_v44, %v1615_v50 }
 0x3f9   :  { %1052 = vmatmul.f32.vlgmr.msra.gmra.mxu2 %v1012_v47  ;;  %v991_v51 = vadd.f32 %v1205_v23, %v990_v45 }
 0x3fb   :  { %v995_v3 = vsel %vm994_vm14, %v1205_v23, %v991_v51 }
 0x3fc   :  { %v1000_v54 = vsel %vm997_vm15, %v999_v0, %v995_v3 }
 0x3fd   :  { %v1009_v62 = vmul.f32 %v1005_v24, %v1000_v54 }
 0x3ff   :  { %v1013_v48 = vadd.f32 %v1009_v62, %v1622_v52 }
 0x401   :  { %1055 = vmatmul.f32.vlgmr.msra.gmra.mxu3 %v1013_v48 }
 0x462   :  { %v1047_v18 = vpop.f32.mrf.mxu0 }
 0x463   :  { %1059 = vst [vmem:[#allocation13] sm:$0xff] %v1047_v18 }
 0x46c   :  { %v1050_v50 = vpop.f32.mrf.mxu1 }
 0x46d   :  { %1060 = vst [vmem:[#allocation13 + $0x8] sm:$0xff] %v1050_v50 }
 0x47c   :  { %v1053_v55 = vpop.f32.mrf.mxu2 }
 0x47d   :  { %1061 = vst [vmem:[#allocation13 + $0x10] sm:$0xff] %v1053_v55 }
 0x484   :  { %v1056_v31 = vpop.f32.mrf.mxu3 }
 0x485   :  { %1062 = vst [vmem:[#allocation13 + $0x18] sm:$0xff] %v1056_v31 }
 0x486   :  { %1075 = dma.vmem_to_hbm [thread:$0]  %s1068_s24, 512, %s1070_s27, [#allocation4], %s1385_s29, %s1385_s29, %s1386_s30  }
 0x487   :  { %1382 = dma.done.wait [#allocation4], 512  }
 0x488   :  { %1383 = vsyncadd [#allocation4], 4294966784 }
 0x489   :  { %1080 = vsyncpa [#allocation3], 1 }
 0x48a   :  { %1081 = vsyncpa [#allocation6], 1 }
 0x48b   :  { %1082 = vsyncpa [#allocation9], 1 }
 0x48c   :  { %1083 = vsyncpa [#allocation12], 1 }
 0x48d   :  { %1084 = vsyncpa [#allocation4], 1 }

</bundles_post_ra>
